<compile_context>
chip_gen: v6e
topology: v6e:2x2x1
jax: 0.10.0
libtpu: 0.0.40
codegen_flags: <defaults>
</compile_context>

<pallas_src>
import functools
import math

import jax
import jax.numpy as jnp
from jax import lax
from jax.experimental import pallas as pl
from jax.experimental.pallas import tpu as pltpu


# ----------------------------- shared recurrence ---------------------------- #

def _lstm_recurrence(x2, wih, whh, bias, h0, c0, gi_ref, lens_col, nd,
                     emit_fn, unroll):
    """Fused (bi)directional LSTM recurrence over one batch tile.

    x2:   (T*Bt, D_in)  bf16  time-major, batch tile on sublanes
    wih:  (D_in, 4G)    bf16  G = nd*H; cols [i_f i_b | f_f f_b | o_f o_b | g_f g_b]
    whh:  (G, 4G)       bf16  block-diagonal per direction, same column order
    bias: (1, 4G)       f32   b_ih + b_hh, packed like wih columns
    h0, c0: (Bt, G)     f32   [fwd | bwd]
    gi_ref: VMEM scratch (T*Bt, 4G) bf16 for the hoisted input projection
    lens_col: (Bt, 1) int32 or None (capture fwd hidden at t = seq_len-1)
    emit_fn: optional callable(t, h_new) for per-step output writes
    Returns (h_final, feat_fwd).
    """
    Bt, G = h0.shape
    H = G // nd
    T = x2.shape[0] // Bt
    G3, G4 = 3 * G, 4 * G

    # Hoisted input projection: one (T*Bt, D) @ (D, 4G) MXU matmul + f32 bias
    # add for the whole sequence and both directions, stored bf16.
    gi_ref[...] = (jnp.dot(x2, wih, preferred_element_type=jnp.float32)
                   + bias).astype(gi_ref.dtype)

    if nd == 2:
        # Within each gate block of width G, the first H lanes are the forward
        # direction.  Hoist the mask out of the loop.
        cols = lax.broadcasted_iota(jnp.int32, (Bt, G4), 1)
        fwd_cols = (cols % G) < H

    def step(t, carry):
        h, c, feat_fwd = carry
        row_f = pl.multiple_of(t * Bt, Bt)
        gin_f = gi_ref[pl.ds(row_f, Bt), :]
        if nd == 2:
            # Backward direction consumes timestep T-1-t (index math only; the
            # extra load+select sits off the h-dependency chain).
            row_b = pl.multiple_of((T - 1 - t) * Bt, Bt)
            gin_b = gi_ref[pl.ds(row_b, Bt), :]
            gin = jnp.where(fwd_cols, gin_f, gin_b)
        else:
            gin = gin_f

        # Only the recurrent matmul sits on the serial critical path.
        gates = gin.astype(jnp.float32) + jnp.dot(
            h.astype(whh.dtype), whh, preferred_element_type=jnp.float32)
        # Gate columns are [i | f | o | g]: one contiguous 3G sigmoid slice.
        sg = jax.nn.sigmoid(gates[:, 0:G3])
        i = sg[:, 0:G]
        f = sg[:, G:2 * G]
        o = sg[:, 2 * G:G3]
        g = jnp.tanh(gates[:, G3:G4])
        c_new = f * c + i * g
        h_new = o * jnp.tanh(c_new)

        if lens_col is not None:
            # Capture forward hidden state at timestep seq_len-1 per batch row.
            sel = lens_col == (t + 1)                       # (Bt, 1)
            feat_fwd = jnp.where(sel, h_new[:, 0:H], feat_fwd)
        if emit_fn is not None:
            emit_fn(t, h_new)
        return (h_new, c_new, feat_fwd)

    feat0 = jnp.zeros((Bt, H), jnp.float32)
    h_fin, _, feat_fwd = lax.fori_loop(0, T, step, (h0, c0, feat0),
                                       unroll=unroll)
    return h_fin, feat_fwd


# ------------------------------ Pallas kernels ------------------------------ #

def _bilstm_last_kernel(x_ref, wih_ref, whh_ref, b_ref, h0_ref, c0_ref,
                        lens_ref, pw_ref, pb_ref, score_ref, gi_ref, *, nd):
    """Last LSTM layer with pooling + Linear + Sigmoid fused as epilogue."""
    Bt, G = h0_ref.shape
    H = G // nd
    T = x_ref.shape[0] // Bt
    h_fin, feat_fwd = _lstm_recurrence(
        x_ref[...], wih_ref[...], whh_ref[...], b_ref[...],
        h0_ref[...], c0_ref[...], gi_ref, lens_ref[...], nd, None,
        unroll=min(T, 8))
    if nd == 2:
        # Backward hidden at original timestep 0 == final backward state.
        feat = jnp.concatenate([feat_fwd, h_fin[:, H:G]], axis=1)   # (Bt, G)
    else:
        feat = feat_fwd
    logits = (jnp.dot(feat, pw_ref[...], preferred_element_type=jnp.float32)
              + pb_ref[...])
    score_ref[...] = jax.nn.sigmoid(logits)


def _bilstm_mid_kernel(x_ref, wih_ref, whh_ref, b_ref, h0_ref, c0_ref,
                       out_ref, gi_ref, *, nd):
    """Intermediate LSTM layer: writes the full (T*Bt, G) sequence for the
    next layer.  One full-width store per step; the backward half is put back
    into original-time order with a single bulk swap pass after the loop."""
    Bt, G = h0_ref.shape
    H = G // nd
    T = x_ref.shape[0] // Bt

    def emit(t, h_new):
        row = pl.multiple_of(t * Bt, Bt)
        out_ref[pl.ds(row, Bt), :] = h_new.astype(out_ref.dtype)

    _lstm_recurrence(x_ref[...], wih_ref[...], whh_ref[...], b_ref[...],
                     h0_ref[...], c0_ref[...], gi_ref, None, nd, emit,
                     unroll=min(T, 8))

    if nd == 2:
        # Bulk, off-critical-path pass: the bwd half stored at loop step t
        # belongs at original timestep T-1-t -> swap bwd columns pairwise.
        colsG = lax.broadcasted_iota(jnp.int32, (Bt, G), 1)
        fwd_g = colsG < H

        def swap(p, carry):
            ra = pl.multiple_of(p * Bt, Bt)
            rb = pl.multiple_of((T - 1 - p) * Bt, Bt)
            a = out_ref[pl.ds(ra, Bt), :]
            bb = out_ref[pl.ds(rb, Bt), :]
            out_ref[pl.ds(ra, Bt), :] = jnp.where(fwd_g, a, bb)
            out_ref[pl.ds(rb, Bt), :] = jnp.where(fwd_g, bb, a)
            return carry

        lax.fori_loop(0, T // 2, swap, 0, unroll=min(max(T // 2, 1), 8))


# ------------------------------ kernel wrappers ----------------------------- #

def _mosaic_params(block_bytes):
    # Explicit scoped-VMEM limit sized from the per-block buffers (default is
    # only 16/32 MiB); generous factor-2 headroom for double-buffering.
    limit = int(min(128 << 20, max(32 << 20, 2 * block_bytes + (8 << 20))))
    return pltpu.CompilerParams(dimension_semantics=("parallel",),
                                vmem_limit_bytes=limit)


def _run_last_layer(x, wih, whh, b, h0, c0, lens, pw, pb, T, Bt, nd):
    nb = x.shape[0]
    D = x.shape[-1]
    Bp, G = h0.shape
    scratch_bytes = T * Bt * 4 * G * 2                       # bf16 gi
    block_bytes = (T * Bt * D * 2 + wih.nbytes + whh.nbytes + b.nbytes
                   + 2 * Bt * G * 4 + Bt * 4 + pw.nbytes + pb.nbytes
                   + Bt * 4 + scratch_bytes)
    return pl.pallas_call(
        functools.partial(_bilstm_last_kernel, nd=nd),
        grid=(nb,),
        in_specs=[
            pl.BlockSpec((None, T * Bt, D), lambda bi: (bi, 0, 0)),
            pl.BlockSpec(wih.shape, lambda bi: (0, 0)),
            pl.BlockSpec(whh.shape, lambda bi: (0, 0)),
            pl.BlockSpec(b.shape, lambda bi: (0, 0)),
            pl.BlockSpec((Bt, G), lambda bi: (bi, 0)),
            pl.BlockSpec((Bt, G), lambda bi: (bi, 0)),
            pl.BlockSpec((Bt, 1), lambda bi: (bi, 0)),
            pl.BlockSpec(pw.shape, lambda bi: (0, 0)),
            pl.BlockSpec(pb.shape, lambda bi: (0, 0)),
        ],
        out_specs=pl.BlockSpec((Bt, 1), lambda bi: (bi, 0)),
        out_shape=jax.ShapeDtypeStruct((Bp, 1), jnp.float32),
        scratch_shapes=[pltpu.VMEM((T * Bt, 4 * G), jnp.bfloat16)],
        compiler_params=_mosaic_params(block_bytes),
    )(x, wih, whh, b, h0, c0, lens, pw, pb)


def _run_mid_layer(x, wih, whh, b, h0, c0, T, Bt, nd):
    nb = x.shape[0]
    D = x.shape[-1]
    Bp, G = h0.shape
    scratch_bytes = T * Bt * 4 * G * 2                       # bf16 gi
    block_bytes = (T * Bt * D * 2 + wih.nbytes + whh.nbytes + b.nbytes
                   + 2 * Bt * G * 4 + T * Bt * G * 2 + scratch_bytes)
    return pl.pallas_call(
        functools.partial(_bilstm_mid_kernel, nd=nd),
        grid=(nb,),
        in_specs=[
            pl.BlockSpec((None, T * Bt, D), lambda bi: (bi, 0, 0)),
            pl.BlockSpec(wih.shape, lambda bi: (0, 0)),
            pl.BlockSpec(whh.shape, lambda bi: (0, 0)),
            pl.BlockSpec(b.shape, lambda bi: (0, 0)),
            pl.BlockSpec((Bt, G), lambda bi: (bi, 0)),
            pl.BlockSpec((Bt, G), lambda bi: (bi, 0)),
        ],
        out_specs=pl.BlockSpec((None, T * Bt, G), lambda bi: (bi, 0, 0)),
        out_shape=jax.ShapeDtypeStruct((nb, T * Bt, G), jnp.bfloat16),
        scratch_shapes=[pltpu.VMEM((T * Bt, 4 * G), jnp.bfloat16)],
        compiler_params=_mosaic_params(block_bytes),
    )(x, wih, whh, b, h0, c0)


# ----------------------------- parameter setup ------------------------------ #

def init_params(key, vec_dim, hidden_dim, num_layers, bidirect=True):
    """Deterministic init matching nn.LSTM / nn.Linear distributions
    (uniform(-1/sqrt(fan), 1/sqrt(fan))), stored in the fused packed layout."""
    H = hidden_dim
    nd = 2 if bidirect else 1
    G = nd * H
    scale = 1.0 / math.sqrt(H)
    # Packed gate-column order: [i | f | o | g] (sigmoid gates contiguous,
    # tanh gate last), each gate block direction-interleaved [fwd | bwd].
    gate_order = (0, 1, 3, 2)          # indices into the standard (i, f, g, o)
    layers = []
    for layer_idx in range(num_layers):
        d_in = vec_dim if layer_idx == 0 else G
        key, k1, k2, k3, k4 = jax.random.split(key, 5)
        wih_t = jax.random.uniform(k1, (nd, d_in, 4 * H), jnp.float32, -scale, scale)
        whh_t = jax.random.uniform(k2, (nd, H, 4 * H), jnp.float32, -scale, scale)
        b_ih = jax.random.uniform(k3, (nd, 4 * H), jnp.float32, -scale, scale)
        b_hh = jax.random.uniform(k4, (nd, 4 * H), jnp.float32, -scale, scale)
        bias = b_ih + b_hh

        wih_cols, bias_cols = [], []
        whh_p = jnp.zeros((G, 4 * G), jnp.float32)
        for gpos, k in enumerate(gate_order):
            for d in range(nd):
                wih_cols.append(wih_t[d, :, k * H:(k + 1) * H])
                bias_cols.append(bias[d, k * H:(k + 1) * H])
                col0 = gpos * G + d * H
                whh_p = whh_p.at[d * H:(d + 1) * H, col0:col0 + H].set(
                    whh_t[d, :, k * H:(k + 1) * H])
        wih_p = jnp.concatenate(wih_cols, axis=1)                 # (d_in, 4G)
        bias_p = jnp.concatenate(bias_cols, axis=0)[None, :]      # (1, 4G)
        layers.append((wih_p.astype(jnp.bfloat16),
                       whh_p.astype(jnp.bfloat16),
                       bias_p.astype(jnp.float32)))

    pscale = 1.0 / math.sqrt(G)
    key, kw, kb = jax.random.split(key, 3)
    proj_w = jax.random.uniform(kw, (G, 1), jnp.float32, -pscale, pscale)
    proj_b = jax.random.uniform(kb, (1, 1), jnp.float32, -pscale, pscale)
    return {"layers": layers, "proj_w": proj_w, "proj_b": proj_b,
            "hidden_dim": H, "num_layers": num_layers, "bidirect": bidirect}


# ------------------------------- forward pass ------------------------------- #

def _pick_batch_tile(Bp):
    # Expose >=2 batch tiles (v7x megacore) when the batch allows it while
    # keeping per-core VMEM bounded.  Bp is always a multiple of 16.
    for bt in (64, 32, 16):
        if Bp % bt == 0 and Bp > bt:
            return bt
    return Bp


def bilstm_forward(params, x, seq_lens, h0, c0):
    """
    x: (B, T, vec_dim) float32 (batch_first, like the torch module)
    seq_lens: (B,) int32 (precondition: 1 <= seq_lens <= T, seq_lens[0] == T)
    h0, c0: (num_layers * num_dirs, B, H) float32 (torch.randn equivalents)
    returns: (score (B, 1), None)
    """
    B, T, D = x.shape
    H = params["hidden_dim"]
    nd = 2 if params["bidirect"] else 1
    G = nd * H
    L = params["num_layers"]
    Bp = max(16, ((B + 15) // 16) * 16)     # pad to bf16 sublane packing (16)
    Bt = _pick_batch_tile(Bp)
    nb = Bp // Bt

    # time-major, batch-padded, arranged per batch tile: (nb, T*Bt, D) bf16.
    x_t = jnp.transpose(x, (1, 0, 2)).astype(jnp.bfloat16)        # (T, B, D)
    x_t = jnp.pad(x_t, ((0, 0), (0, Bp - B), (0, 0)))             # (T, Bp, D)
    inp = x_t.reshape(T, nb, Bt, D).transpose(1, 0, 2, 3).reshape(nb, T * Bt, D)

    lens_col = jnp.pad(seq_lens.astype(jnp.int32), (0, Bp - B)).reshape(Bp, 1)

    def pack_state(s, layer):
        parts = [s[layer * nd + d] for d in range(nd)]
        st = jnp.concatenate(parts, axis=1).astype(jnp.float32)   # (B, G)
        return jnp.pad(st, ((0, Bp - B), (0, 0)))                 # (Bp, G)

    score_p = None
    for l in range(L):
        wih, whh, b = params["layers"][l]
        h0_l = pack_state(h0, l)
        c0_l = pack_state(c0, l)
        if l < L - 1:
            inp = _run_mid_layer(inp, wih, whh, b, h0_l, c0_l, T, Bt, nd)
        else:
            score_p = _run_last_layer(inp, wih, whh, b, h0_l, c0_l, lens_col,
                                      params["proj_w"], params["proj_b"],
                                      T, Bt, nd)
    return score_p[:B], None


# ----------------------------------- main ----------------------------------- #

if __name__ == "__main__":
    vec_dim, seq_len, hidden_dim, num_layers = 16, 8, 32, 2
    batch = 2

    key = jax.random.PRNGKey(0)
    key, kp, kx, kh, kc = jax.random.split(key, 5)

    params = init_params(kp, vec_dim, hidden_dim, num_layers, bidirect=True)

    x = jax.random.normal(kx, (batch, seq_len, vec_dim), jnp.float32)
    seq_lens = jnp.array([seq_len, 5], dtype=jnp.int32)  # sorted desc, [0]==T
    # torch.randn h0/c0 equivalents (module creates them fresh each forward):
    h0 = jax.random.normal(kh, (num_layers * 2, batch, hidden_dim), jnp.float32)
    c0 = jax.random.normal(kc, (num_layers * 2, batch, hidden_dim), jnp.float32)

    score, _ = bilstm_forward(params, x, seq_lens, h0, c0)
    score = jax.block_until_ready(score)
    assert score.shape == (batch, 1)
    assert bool(jnp.all((score >= 0.0) & (score <= 1.0)))
    assert bool(jnp.all(jnp.isfinite(score)))
    print("KERNEL_OK")
</pallas_src>

<mosaic_0001>
module attributes {stable_mosaic.version = 11 : i64} {
  func.func @_bilstm_mid_kernel(%arg0: i32, %arg1: memref<1x128x16xbf16, #tpu.memory_space<vmem>>, %arg2: memref<16x256xbf16, #tpu.memory_space<vmem>>, %arg3: memref<64x256xbf16, #tpu.memory_space<vmem>>, %arg4: memref<1x256xf32, #tpu.memory_space<vmem>>, %arg5: memref<16x64xf32, #tpu.memory_space<vmem>>, %arg6: memref<16x64xf32, #tpu.memory_space<vmem>>, %arg7: memref<1x128x64xbf16, #tpu.memory_space<vmem>>, %arg8: memref<128x256xbf16, #tpu.memory_space<vmem>>) attributes {dimension_semantics = [#tpu.dimension_semantics<parallel>], iteration_bounds = array<i64: 1>, scalar_prefetch = 0 : i64, scratch_operands = 1 : i64, tpu.core_type = #tpu.core_type<tc>, window_params = [{transform_indices = @transform_0, window_bounds = array<i64: 1, 128, 16>}, {pipeline_mode = #tpu.pipeline_mode<synchronous>, transform_indices = @transform_1, window_bounds = array<i64: 16, 256>}, {pipeline_mode = #tpu.pipeline_mode<synchronous>, transform_indices = @transform_2, window_bounds = array<i64: 64, 256>}, {pipeline_mode = #tpu.pipeline_mode<synchronous>, transform_indices = @transform_3, window_bounds = array<i64: 1, 256>}, {transform_indices = @transform_4, window_bounds = array<i64: 16, 64>}, {transform_indices = @transform_5, window_bounds = array<i64: 16, 64>}, {transform_indices = @transform_6, window_bounds = array<i64: 1, 128, 64>}]} {
    %c0 = arith.constant 0 : index
    %c0_0 = arith.constant 0 : index
    %c0_1 = arith.constant 0 : index
    %0 = vector.load %arg1[%c0, %c0_0, %c0_1] : memref<1x128x16xbf16, #tpu.memory_space<vmem>>, vector<1x128x16xbf16>
    %1 = vector.shape_cast %0 : vector<1x128x16xbf16> to vector<128x16xbf16>
    %c0_2 = arith.constant 0 : index
    %c0_3 = arith.constant 0 : index
    %2 = vector.load %arg2[%c0_2, %c0_3] : memref<16x256xbf16, #tpu.memory_space<vmem>>, vector<16x256xbf16>
    %c0_4 = arith.constant 0 : index
    %c0_5 = arith.constant 0 : index
    %3 = vector.load %arg3[%c0_4, %c0_5] : memref<64x256xbf16, #tpu.memory_space<vmem>>, vector<64x256xbf16>
    %c0_6 = arith.constant 0 : index
    %c0_7 = arith.constant 0 : index
    %4 = vector.load %arg4[%c0_6, %c0_7] : memref<1x256xf32, #tpu.memory_space<vmem>>, vector<1x256xf32>
    %c0_8 = arith.constant 0 : index
    %c0_9 = arith.constant 0 : index
    %5 = vector.load %arg5[%c0_8, %c0_9] : memref<16x64xf32, #tpu.memory_space<vmem>>, vector<16x64xf32>
    %c0_10 = arith.constant 0 : index
    %c0_11 = arith.constant 0 : index
    %6 = vector.load %arg6[%c0_10, %c0_11] : memref<16x64xf32, #tpu.memory_space<vmem>>, vector<16x64xf32>
    %cst = arith.constant dense<0.000000e+00> : vector<128x256xf32>
    %7 = tpu.matmul %1, %2, %cst {dimension_numbers = #tpu.dot_dimension_numbers<[1], [0], [0], [1], [0, 0, 1, 1], [], []>} : vector<128x16xbf16>, vector<16x256xbf16>, vector<128x256xf32> -> vector<128x256xf32>
    %8 = vector.broadcast %4 : vector<1x256xf32> to vector<128x256xf32>
    %9 = arith.addf %7, %8 : vector<128x256xf32>
    %10 = arith.truncf %9 : vector<128x256xf32> to vector<128x256xbf16>
    %c0_12 = arith.constant 0 : index
    %c0_13 = arith.constant 0 : index
    %11 = vector.load %arg8[%c0_12, %c0_13] : memref<128x256xbf16, #tpu.memory_space<vmem>>, vector<128x256xbf16>
    tpu.vector_store %arg8[%c0_12, %c0_13], %10 {strides = array<i32>} : memref<128x256xbf16, #tpu.memory_space<vmem>>, vector<128x256xbf16>,
    %12 = tpu.iota {dimensions = array<i32: 1>} : vector<16x256xi32>
    %c64_i32 = arith.constant 64 : i32
    %c0_i32 = arith.constant 0 : i32
    %13 = arith.cmpi eq, %c64_i32, %c0_i32 : i32
    %c1_i32 = arith.constant 1 : i32
    %14 = arith.select %13, %c1_i32, %c64_i32 : i32
    %15 = vector.broadcast %14 : i32 to vector<16x256xi32>
    %16 = arith.remsi %12, %15 : vector<16x256xi32>
    %c0_i32_14 = arith.constant 0 : i32
    %17 = vector.broadcast %c0_i32_14 : i32 to vector<16x256xi32>
    %18 = arith.cmpi ne, %16, %17 : vector<16x256xi32>
    %c0_i32_15 = arith.constant 0 : i32
    %19 = vector.broadcast %c0_i32_15 : i32 to vector<16x256xi32>
    %20 = arith.cmpi slt, %16, %19 : vector<16x256xi32>
    %c0_i32_16 = arith.constant 0 : i32
    %21 = arith.cmpi slt, %14, %c0_i32_16 : i32
    %22 = vector.broadcast %21 : i1 to vector<16x256xi1>
    %23 = vector.broadcast %22 : vector<16x256xi1> to vector<16x256xi1>
    %24 = arith.xori %20, %23 : vector<16x256xi1>
    %25 = arith.andi %24, %18 : vector<16x256xi1>
    %26 = vector.broadcast %14 : i32 to vector<16x256xi32>
    %27 = arith.addi %16, %26 : vector<16x256xi32>
    %28 = arith.select %25, %27, %16 : vector<16x256xi1>, vector<16x256xi32>
    %c32_i32 = arith.constant 32 : i32
    %29 = vector.broadcast %c32_i32 : i32 to vector<16x256xi32>
    %30 = arith.cmpi slt, %28, %29 : vector<16x256xi32>
    %c0_i32_17 = arith.constant 0 : i32
    %c16_i32 = arith.constant 16 : i32
    %31 = arith.muli %c0_i32_17, %c16_i32 : i32
    %32 = tpu.assume_multiple %31, 16 : i32
    %33 = arith.index_cast %32 : i32 to index
    %c0_18 = arith.constant 0 : index
    %34 = vector.load %arg8[%33, %c0_18] : memref<128x256xbf16, #tpu.memory_space<vmem>>, vector<16x256xbf16>
    %c7_i32 = arith.constant 7 : i32
    %35 = arith.subi %c7_i32, %c0_i32_17 : i32
    %c16_i32_19 = arith.constant 16 : i32
    %36 = arith.muli %35, %c16_i32_19 : i32
    %37 = tpu.assume_multiple %36, 16 : i32
    %38 = arith.index_cast %37 : i32 to index
    %c0_20 = arith.constant 0 : index
    %39 = vector.load %arg8[%38, %c0_20] : memref<128x256xbf16, #tpu.memory_space<vmem>>, vector<16x256xbf16>
    %40 = arith.select %30, %34, %39 : vector<16x256xi1>, vector<16x256xbf16>
    %41 = arith.extf %40 : vector<16x256xbf16> to vector<16x256xf32>
    %42 = arith.truncf %5 : vector<16x64xf32> to vector<16x64xbf16>
    %cst_21 = arith.constant dense<0.000000e+00> : vector<16x256xf32>
    %43 = tpu.matmul %42, %3, %cst_21 {dimension_numbers = #tpu.dot_dimension_numbers<[1], [0], [0], [1], [0, 0, 1, 1], [], []>} : vector<16x64xbf16>, vector<64x256xbf16>, vector<16x256xf32> -> vector<16x256xf32>
    %44 = arith.addf %41, %43 : vector<16x256xf32>
    %45 = vector.extract_strided_slice %44 {offsets = [0, 0], sizes = [16, 192], strides = [1, 1]} : vector<16x256xf32> to vector<16x192xf32>
    %46 = arith.negf %45 : vector<16x192xf32>
    %47 = math.exp %46 : vector<16x192xf32>
    %cst_22 = arith.constant 1.000000e+00 : f32
    %48 = vector.broadcast %cst_22 : f32 to vector<16x192xf32>
    %49 = arith.addf %48, %47 : vector<16x192xf32>
    %50 = arith.divf %48, %49 : vector<16x192xf32>
    %51 = vector.extract_strided_slice %50 {offsets = [0, 0], sizes = [16, 64], strides = [1, 1]} : vector<16x192xf32> to vector<16x64xf32>
    %52 = vector.extract_strided_slice %50 {offsets = [0, 64], sizes = [16, 64], strides = [1, 1]} : vector<16x192xf32> to vector<16x64xf32>
    %53 = vector.extract_strided_slice %50 {offsets = [0, 128], sizes = [16, 64], strides = [1, 1]} : vector<16x192xf32> to vector<16x64xf32>
    %54 = vector.extract_strided_slice %44 {offsets = [0, 192], sizes = [16, 64], strides = [1, 1]} : vector<16x256xf32> to vector<16x64xf32>
    %55 = math.tanh %54 : vector<16x64xf32>
    %56 = arith.mulf %52, %6 : vector<16x64xf32>
    %57 = arith.mulf %51, %55 : vector<16x64xf32>
    %58 = arith.addf %56, %57 : vector<16x64xf32>
    %59 = math.tanh %58 : vector<16x64xf32>
    %60 = arith.mulf %53, %59 : vector<16x64xf32>
    %c16_i32_23 = arith.constant 16 : i32
    %61 = arith.muli %c0_i32_17, %c16_i32_23 : i32
    %62 = tpu.assume_multiple %61, 16 : i32
    %63 = arith.truncf %60 : vector<16x64xf32> to vector<16x64xbf16>
    %c0_24 = arith.constant 0 : index
    %64 = arith.index_cast %62 : i32 to index
    %c0_25 = arith.constant 0 : index
    %65 = vector.load %arg7[%c0_24, %64, %c0_25] : memref<1x128x64xbf16, #tpu.memory_space<vmem>>, vector<1x16x64xbf16>
    %66 = vector.shape_cast %65 : vector<1x16x64xbf16> to vector<16x64xbf16>
    %67 = vector.shape_cast %63 : vector<16x64xbf16> to vector<1x16x64xbf16>
    tpu.vector_store %arg7[%c0_24, %64, %c0_25], %67 {strides = array<i32>} : memref<1x128x64xbf16, #tpu.memory_space<vmem>>, vector<1x16x64xbf16>,
    %c1_i32_26 = arith.constant 1 : i32
    %c16_i32_27 = arith.constant 16 : i32
    %68 = arith.muli %c1_i32_26, %c16_i32_27 : i32
    %69 = tpu.assume_multiple %68, 16 : i32
    %70 = arith.index_cast %69 : i32 to index
    %c0_28 = arith.constant 0 : index
    %71 = vector.load %arg8[%70, %c0_28] : memref<128x256xbf16, #tpu.memory_space<vmem>>, vector<16x256xbf16>
    %c7_i32_29 = arith.constant 7 : i32
    %72 = arith.subi %c7_i32_29, %c1_i32_26 : i32
    %c16_i32_30 = arith.constant 16 : i32
    %73 = arith.muli %72, %c16_i32_30 : i32
    %74 = tpu.assume_multiple %73, 16 : i32
    %75 = arith.index_cast %74 : i32 to index
    %c0_31 = arith.constant 0 : index
    %76 = vector.load %arg8[%75, %c0_31] : memref<128x256xbf16, #tpu.memory_space<vmem>>, vector<16x256xbf16>
    %77 = arith.select %30, %71, %76 : vector<16x256xi1>, vector<16x256xbf16>
    %78 = arith.extf %77 : vector<16x256xbf16> to vector<16x256xf32>
    %79 = arith.truncf %60 : vector<16x64xf32> to vector<16x64xbf16>
    %cst_32 = arith.constant dense<0.000000e+00> : vector<16x256xf32>
    %80 = tpu.matmul %79, %3, %cst_32 {dimension_numbers = #tpu.dot_dimension_numbers<[1], [0], [0], [1], [0, 0, 1, 1], [], []>} : vector<16x64xbf16>, vector<64x256xbf16>, vector<16x256xf32> -> vector<16x256xf32>
    %81 = arith.addf %78, %80 : vector<16x256xf32>
    %82 = vector.extract_strided_slice %81 {offsets = [0, 0], sizes = [16, 192], strides = [1, 1]} : vector<16x256xf32> to vector<16x192xf32>
    %83 = arith.negf %82 : vector<16x192xf32>
    %84 = math.exp %83 : vector<16x192xf32>
    %cst_33 = arith.constant 1.000000e+00 : f32
    %85 = vector.broadcast %cst_33 : f32 to vector<16x192xf32>
    %86 = arith.addf %85, %84 : vector<16x192xf32>
    %87 = arith.divf %85, %86 : vector<16x192xf32>
    %88 = vector.extract_strided_slice %87 {offsets = [0, 0], sizes = [16, 64], strides = [1, 1]} : vector<16x192xf32> to vector<16x64xf32>
    %89 = vector.extract_strided_slice %87 {offsets = [0, 64], sizes = [16, 64], strides = [1, 1]} : vector<16x192xf32> to vector<16x64xf32>
    %90 = vector.extract_strided_slice %87 {offsets = [0, 128], sizes = [16, 64], strides = [1, 1]} : vector<16x192xf32> to vector<16x64xf32>
    %91 = vector.extract_strided_slice %81 {offsets = [0, 192], sizes = [16, 64], strides = [1, 1]} : vector<16x256xf32> to vector<16x64xf32>
    %92 = math.tanh %91 : vector<16x64xf32>
    %93 = arith.mulf %89, %58 : vector<16x64xf32>
    %94 = arith.mulf %88, %92 : vector<16x64xf32>
    %95 = arith.addf %93, %94 : vector<16x64xf32>
    %96 = math.tanh %95 : vector<16x64xf32>
    %97 = arith.mulf %90, %96 : vector<16x64xf32>
    %c16_i32_34 = arith.constant 16 : i32
    %98 = arith.muli %c1_i32_26, %c16_i32_34 : i32
    %99 = tpu.assume_multiple %98, 16 : i32
    %100 = arith.truncf %97 : vector<16x64xf32> to vector<16x64xbf16>
    %c0_35 = arith.constant 0 : index
    %101 = arith.index_cast %99 : i32 to index
    %c0_36 = arith.constant 0 : index
    %102 = vector.load %arg7[%c0_35, %101, %c0_36] : memref<1x128x64xbf16, #tpu.memory_space<vmem>>, vector<1x16x64xbf16>
    %103 = vector.shape_cast %102 : vector<1x16x64xbf16> to vector<16x64xbf16>
    %104 = vector.shape_cast %100 : vector<16x64xbf16> to vector<1x16x64xbf16>
    tpu.vector_store %arg7[%c0_35, %101, %c0_36], %104 {strides = array<i32>} : memref<1x128x64xbf16, #tpu.memory_space<vmem>>, vector<1x16x64xbf16>,
    %c2_i32 = arith.constant 2 : i32
    %c16_i32_37 = arith.constant 16 : i32
    %105 = arith.muli %c2_i32, %c16_i32_37 : i32
    %106 = tpu.assume_multiple %105, 16 : i32
    %107 = arith.index_cast %106 : i32 to index
    %c0_38 = arith.constant 0 : index
    %108 = vector.load %arg8[%107, %c0_38] : memref<128x256xbf16, #tpu.memory_space<vmem>>, vector<16x256xbf16>
    %c7_i32_39 = arith.constant 7 : i32
    %109 = arith.subi %c7_i32_39, %c2_i32 : i32
    %c16_i32_40 = arith.constant 16 : i32
    %110 = arith.muli %109, %c16_i32_40 : i32
    %111 = tpu.assume_multiple %110, 16 : i32
    %112 = arith.index_cast %111 : i32 to index
    %c0_41 = arith.constant 0 : index
    %113 = vector.load %arg8[%112, %c0_41] : memref<128x256xbf16, #tpu.memory_space<vmem>>, vector<16x256xbf16>
    %114 = arith.select %30, %108, %113 : vector<16x256xi1>, vector<16x256xbf16>
    %115 = arith.extf %114 : vector<16x256xbf16> to vector<16x256xf32>
    %116 = arith.truncf %97 : vector<16x64xf32> to vector<16x64xbf16>
    %cst_42 = arith.constant dense<0.000000e+00> : vector<16x256xf32>
    %117 = tpu.matmul %116, %3, %cst_42 {dimension_numbers = #tpu.dot_dimension_numbers<[1], [0], [0], [1], [0, 0, 1, 1], [], []>} : vector<16x64xbf16>, vector<64x256xbf16>, vector<16x256xf32> -> vector<16x256xf32>
    %118 = arith.addf %115, %117 : vector<16x256xf32>
    %119 = vector.extract_strided_slice %118 {offsets = [0, 0], sizes = [16, 192], strides = [1, 1]} : vector<16x256xf32> to vector<16x192xf32>
    %120 = arith.negf %119 : vector<16x192xf32>
    %121 = math.exp %120 : vector<16x192xf32>
    %cst_43 = arith.constant 1.000000e+00 : f32
    %122 = vector.broadcast %cst_43 : f32 to vector<16x192xf32>
    %123 = arith.addf %122, %121 : vector<16x192xf32>
    %124 = arith.divf %122, %123 : vector<16x192xf32>
    %125 = vector.extract_strided_slice %124 {offsets = [0, 0], sizes = [16, 64], strides = [1, 1]} : vector<16x192xf32> to vector<16x64xf32>
    %126 = vector.extract_strided_slice %124 {offsets = [0, 64], sizes = [16, 64], strides = [1, 1]} : vector<16x192xf32> to vector<16x64xf32>
    %127 = vector.extract_strided_slice %124 {offsets = [0, 128], sizes = [16, 64], strides = [1, 1]} : vector<16x192xf32> to vector<16x64xf32>
    %128 = vector.extract_strided_slice %118 {offsets = [0, 192], sizes = [16, 64], strides = [1, 1]} : vector<16x256xf32> to vector<16x64xf32>
    %129 = math.tanh %128 : vector<16x64xf32>
    %130 = arith.mulf %126, %95 : vector<16x64xf32>
    %131 = arith.mulf %125, %129 : vector<16x64xf32>
    %132 = arith.addf %130, %131 : vector<16x64xf32>
    %133 = math.tanh %132 : vector<16x64xf32>
    %134 = arith.mulf %127, %133 : vector<16x64xf32>
    %c16_i32_44 = arith.constant 16 : i32
    %135 = arith.muli %c2_i32, %c16_i32_44 : i32
    %136 = tpu.assume_multiple %135, 16 : i32
    %137 = arith.truncf %134 : vector<16x64xf32> to vector<16x64xbf16>
    %c0_45 = arith.constant 0 : index
    %138 = arith.index_cast %136 : i32 to index
    %c0_46 = arith.constant 0 : index
    %139 = vector.load %arg7[%c0_45, %138, %c0_46] : memref<1x128x64xbf16, #tpu.memory_space<vmem>>, vector<1x16x64xbf16>
    %140 = vector.shape_cast %139 : vector<1x16x64xbf16> to vector<16x64xbf16>
    %141 = vector.shape_cast %137 : vector<16x64xbf16> to vector<1x16x64xbf16>
    tpu.vector_store %arg7[%c0_45, %138, %c0_46], %141 {strides = array<i32>} : memref<1x128x64xbf16, #tpu.memory_space<vmem>>, vector<1x16x64xbf16>,
    %c3_i32 = arith.constant 3 : i32
    %c16_i32_47 = arith.constant 16 : i32
    %142 = arith.muli %c3_i32, %c16_i32_47 : i32
    %143 = tpu.assume_multiple %142, 16 : i32
    %144 = arith.index_cast %143 : i32 to index
    %c0_48 = arith.constant 0 : index
    %145 = vector.load %arg8[%144, %c0_48] : memref<128x256xbf16, #tpu.memory_space<vmem>>, vector<16x256xbf16>
    %c7_i32_49 = arith.constant 7 : i32
    %146 = arith.subi %c7_i32_49, %c3_i32 : i32
    %c16_i32_50 = arith.constant 16 : i32
    %147 = arith.muli %146, %c16_i32_50 : i32
    %148 = tpu.assume_multiple %147, 16 : i32
    %149 = arith.index_cast %148 : i32 to index
    %c0_51 = arith.constant 0 : index
    %150 = vector.load %arg8[%149, %c0_51] : memref<128x256xbf16, #tpu.memory_space<vmem>>, vector<16x256xbf16>
    %151 = arith.select %30, %145, %150 : vector<16x256xi1>, vector<16x256xbf16>
    %152 = arith.extf %151 : vector<16x256xbf16> to vector<16x256xf32>
    %153 = arith.truncf %134 : vector<16x64xf32> to vector<16x64xbf16>
    %cst_52 = arith.constant dense<0.000000e+00> : vector<16x256xf32>
    %154 = tpu.matmul %153, %3, %cst_52 {dimension_numbers = #tpu.dot_dimension_numbers<[1], [0], [0], [1], [0, 0, 1, 1], [], []>} : vector<16x64xbf16>, vector<64x256xbf16>, vector<16x256xf32> -> vector<16x256xf32>
    %155 = arith.addf %152, %154 : vector<16x256xf32>
    %156 = vector.extract_strided_slice %155 {offsets = [0, 0], sizes = [16, 192], strides = [1, 1]} : vector<16x256xf32> to vector<16x192xf32>
    %157 = arith.negf %156 : vector<16x192xf32>
    %158 = math.exp %157 : vector<16x192xf32>
    %cst_53 = arith.constant 1.000000e+00 : f32
    %159 = vector.broadcast %cst_53 : f32 to vector<16x192xf32>
    %160 = arith.addf %159, %158 : vector<16x192xf32>
    %161 = arith.divf %159, %160 : vector<16x192xf32>
    %162 = vector.extract_strided_slice %161 {offsets = [0, 0], sizes = [16, 64], strides = [1, 1]} : vector<16x192xf32> to vector<16x64xf32>
    %163 = vector.extract_strided_slice %161 {offsets = [0, 64], sizes = [16, 64], strides = [1, 1]} : vector<16x192xf32> to vector<16x64xf32>
    %164 = vector.extract_strided_slice %161 {offsets = [0, 128], sizes = [16, 64], strides = [1, 1]} : vector<16x192xf32> to vector<16x64xf32>
    %165 = vector.extract_strided_slice %155 {offsets = [0, 192], sizes = [16, 64], strides = [1, 1]} : vector<16x256xf32> to vector<16x64xf32>
    %166 = math.tanh %165 : vector<16x64xf32>
    %167 = arith.mulf %163, %132 : vector<16x64xf32>
    %168 = arith.mulf %162, %166 : vector<16x64xf32>
    %169 = arith.addf %167, %168 : vector<16x64xf32>
    %170 = math.tanh %169 : vector<16x64xf32>
    %171 = arith.mulf %164, %170 : vector<16x64xf32>
    %c16_i32_54 = arith.constant 16 : i32
    %172 = arith.muli %c3_i32, %c16_i32_54 : i32
    %173 = tpu.assume_multiple %172, 16 : i32
    %174 = arith.truncf %171 : vector<16x64xf32> to vector<16x64xbf16>
    %c0_55 = arith.constant 0 : index
    %175 = arith.index_cast %173 : i32 to index
    %c0_56 = arith.constant 0 : index
    %176 = vector.load %arg7[%c0_55, %175, %c0_56] : memref<1x128x64xbf16, #tpu.memory_space<vmem>>, vector<1x16x64xbf16>
    %177 = vector.shape_cast %176 : vector<1x16x64xbf16> to vector<16x64xbf16>
    %178 = vector.shape_cast %174 : vector<16x64xbf16> to vector<1x16x64xbf16>
    tpu.vector_store %arg7[%c0_55, %175, %c0_56], %178 {strides = array<i32>} : memref<1x128x64xbf16, #tpu.memory_space<vmem>>, vector<1x16x64xbf16>,
    %c4_i32 = arith.constant 4 : i32
    %c16_i32_57 = arith.constant 16 : i32
    %179 = arith.muli %c4_i32, %c16_i32_57 : i32
    %180 = tpu.assume_multiple %179, 16 : i32
    %181 = arith.index_cast %180 : i32 to index
    %c0_58 = arith.constant 0 : index
    %182 = vector.load %arg8[%181, %c0_58] : memref<128x256xbf16, #tpu.memory_space<vmem>>, vector<16x256xbf16>
    %c7_i32_59 = arith.constant 7 : i32
    %183 = arith.subi %c7_i32_59, %c4_i32 : i32
    %c16_i32_60 = arith.constant 16 : i32
    %184 = arith.muli %183, %c16_i32_60 : i32
    %185 = tpu.assume_multiple %184, 16 : i32
    %186 = arith.index_cast %185 : i32 to index
    %c0_61 = arith.constant 0 : index
    %187 = vector.load %arg8[%186, %c0_61] : memref<128x256xbf16, #tpu.memory_space<vmem>>, vector<16x256xbf16>
    %188 = arith.select %30, %182, %187 : vector<16x256xi1>, vector<16x256xbf16>
    %189 = arith.extf %188 : vector<16x256xbf16> to vector<16x256xf32>
    %190 = arith.truncf %171 : vector<16x64xf32> to vector<16x64xbf16>
    %cst_62 = arith.constant dense<0.000000e+00> : vector<16x256xf32>
    %191 = tpu.matmul %190, %3, %cst_62 {dimension_numbers = #tpu.dot_dimension_numbers<[1], [0], [0], [1], [0, 0, 1, 1], [], []>} : vector<16x64xbf16>, vector<64x256xbf16>, vector<16x256xf32> -> vector<16x256xf32>
    %192 = arith.addf %189, %191 : vector<16x256xf32>
    %193 = vector.extract_strided_slice %192 {offsets = [0, 0], sizes = [16, 192], strides = [1, 1]} : vector<16x256xf32> to vector<16x192xf32>
    %194 = arith.negf %193 : vector<16x192xf32>
    %195 = math.exp %194 : vector<16x192xf32>
    %cst_63 = arith.constant 1.000000e+00 : f32
    %196 = vector.broadcast %cst_63 : f32 to vector<16x192xf32>
    %197 = arith.addf %196, %195 : vector<16x192xf32>
    %198 = arith.divf %196, %197 : vector<16x192xf32>
    %199 = vector.extract_strided_slice %198 {offsets = [0, 0], sizes = [16, 64], strides = [1, 1]} : vector<16x192xf32> to vector<16x64xf32>
    %200 = vector.extract_strided_slice %198 {offsets = [0, 64], sizes = [16, 64], strides = [1, 1]} : vector<16x192xf32> to vector<16x64xf32>
    %201 = vector.extract_strided_slice %198 {offsets = [0, 128], sizes = [16, 64], strides = [1, 1]} : vector<16x192xf32> to vector<16x64xf32>
    %202 = vector.extract_strided_slice %192 {offsets = [0, 192], sizes = [16, 64], strides = [1, 1]} : vector<16x256xf32> to vector<16x64xf32>
    %203 = math.tanh %202 : vector<16x64xf32>
    %204 = arith.mulf %200, %169 : vector<16x64xf32>
    %205 = arith.mulf %199, %203 : vector<16x64xf32>
    %206 = arith.addf %204, %205 : vector<16x64xf32>
    %207 = math.tanh %206 : vector<16x64xf32>
    %208 = arith.mulf %201, %207 : vector<16x64xf32>
    %c16_i32_64 = arith.constant 16 : i32
    %209 = arith.muli %c4_i32, %c16_i32_64 : i32
    %210 = tpu.assume_multiple %209, 16 : i32
    %211 = arith.truncf %208 : vector<16x64xf32> to vector<16x64xbf16>
    %c0_65 = arith.constant 0 : index
    %212 = arith.index_cast %210 : i32 to index
    %c0_66 = arith.constant 0 : index
    %213 = vector.load %arg7[%c0_65, %212, %c0_66] : memref<1x128x64xbf16, #tpu.memory_space<vmem>>, vector<1x16x64xbf16>
    %214 = vector.shape_cast %213 : vector<1x16x64xbf16> to vector<16x64xbf16>
    %215 = vector.shape_cast %211 : vector<16x64xbf16> to vector<1x16x64xbf16>
    tpu.vector_store %arg7[%c0_65, %212, %c0_66], %215 {strides = array<i32>} : memref<1x128x64xbf16, #tpu.memory_space<vmem>>, vector<1x16x64xbf16>,
    %c5_i32 = arith.constant 5 : i32
    %c16_i32_67 = arith.constant 16 : i32
    %216 = arith.muli %c5_i32, %c16_i32_67 : i32
    %217 = tpu.assume_multiple %216, 16 : i32
    %218 = arith.index_cast %217 : i32 to index
    %c0_68 = arith.constant 0 : index
    %219 = vector.load %arg8[%218, %c0_68] : memref<128x256xbf16, #tpu.memory_space<vmem>>, vector<16x256xbf16>
    %c7_i32_69 = arith.constant 7 : i32
    %220 = arith.subi %c7_i32_69, %c5_i32 : i32
    %c16_i32_70 = arith.constant 16 : i32
    %221 = arith.muli %220, %c16_i32_70 : i32
    %222 = tpu.assume_multiple %221, 16 : i32
    %223 = arith.index_cast %222 : i32 to index
    %c0_71 = arith.constant 0 : index
    %224 = vector.load %arg8[%223, %c0_71] : memref<128x256xbf16, #tpu.memory_space<vmem>>, vector<16x256xbf16>
    %225 = arith.select %30, %219, %224 : vector<16x256xi1>, vector<16x256xbf16>
    %226 = arith.extf %225 : vector<16x256xbf16> to vector<16x256xf32>
    %227 = arith.truncf %208 : vector<16x64xf32> to vector<16x64xbf16>
    %cst_72 = arith.constant dense<0.000000e+00> : vector<16x256xf32>
    %228 = tpu.matmul %227, %3, %cst_72 {dimension_numbers = #tpu.dot_dimension_numbers<[1], [0], [0], [1], [0, 0, 1, 1], [], []>} : vector<16x64xbf16>, vector<64x256xbf16>, vector<16x256xf32> -> vector<16x256xf32>
    %229 = arith.addf %226, %228 : vector<16x256xf32>
    %230 = vector.extract_strided_slice %229 {offsets = [0, 0], sizes = [16, 192], strides = [1, 1]} : vector<16x256xf32> to vector<16x192xf32>
    %231 = arith.negf %230 : vector<16x192xf32>
    %232 = math.exp %231 : vector<16x192xf32>
    %cst_73 = arith.constant 1.000000e+00 : f32
    %233 = vector.broadcast %cst_73 : f32 to vector<16x192xf32>
    %234 = arith.addf %233, %232 : vector<16x192xf32>
    %235 = arith.divf %233, %234 : vector<16x192xf32>
    %236 = vector.extract_strided_slice %235 {offsets = [0, 0], sizes = [16, 64], strides = [1, 1]} : vector<16x192xf32> to vector<16x64xf32>
    %237 = vector.extract_strided_slice %235 {offsets = [0, 64], sizes = [16, 64], strides = [1, 1]} : vector<16x192xf32> to vector<16x64xf32>
    %238 = vector.extract_strided_slice %235 {offsets = [0, 128], sizes = [16, 64], strides = [1, 1]} : vector<16x192xf32> to vector<16x64xf32>
    %239 = vector.extract_strided_slice %229 {offsets = [0, 192], sizes = [16, 64], strides = [1, 1]} : vector<16x256xf32> to vector<16x64xf32>
    %240 = math.tanh %239 : vector<16x64xf32>
    %241 = arith.mulf %237, %206 : vector<16x64xf32>
    %242 = arith.mulf %236, %240 : vector<16x64xf32>
    %243 = arith.addf %241, %242 : vector<16x64xf32>
    %244 = math.tanh %243 : vector<16x64xf32>
    %245 = arith.mulf %238, %244 : vector<16x64xf32>
    %c16_i32_74 = arith.constant 16 : i32
    %246 = arith.muli %c5_i32, %c16_i32_74 : i32
    %247 = tpu.assume_multiple %246, 16 : i32
    %248 = arith.truncf %245 : vector<16x64xf32> to vector<16x64xbf16>
    %c0_75 = arith.constant 0 : index
    %249 = arith.index_cast %247 : i32 to index
    %c0_76 = arith.constant 0 : index
    %250 = vector.load %arg7[%c0_75, %249, %c0_76] : memref<1x128x64xbf16, #tpu.memory_space<vmem>>, vector<1x16x64xbf16>
    %251 = vector.shape_cast %250 : vector<1x16x64xbf16> to vector<16x64xbf16>
    %252 = vector.shape_cast %248 : vector<16x64xbf16> to vector<1x16x64xbf16>
    tpu.vector_store %arg7[%c0_75, %249, %c0_76], %252 {strides = array<i32>} : memref<1x128x64xbf16, #tpu.memory_space<vmem>>, vector<1x16x64xbf16>,
    %c6_i32 = arith.constant 6 : i32
    %c16_i32_77 = arith.constant 16 : i32
    %253 = arith.muli %c6_i32, %c16_i32_77 : i32
    %254 = tpu.assume_multiple %253, 16 : i32
    %255 = arith.index_cast %254 : i32 to index
    %c0_78 = arith.constant 0 : index
    %256 = vector.load %arg8[%255, %c0_78] : memref<128x256xbf16, #tpu.memory_space<vmem>>, vector<16x256xbf16>
    %c7_i32_79 = arith.constant 7 : i32
    %257 = arith.subi %c7_i32_79, %c6_i32 : i32
    %c16_i32_80 = arith.constant 16 : i32
    %258 = arith.muli %257, %c16_i32_80 : i32
    %259 = tpu.assume_multiple %258, 16 : i32
    %260 = arith.index_cast %259 : i32 to index
    %c0_81 = arith.constant 0 : index
    %261 = vector.load %arg8[%260, %c0_81] : memref<128x256xbf16, #tpu.memory_space<vmem>>, vector<16x256xbf16>
    %262 = arith.select %30, %256, %261 : vector<16x256xi1>, vector<16x256xbf16>
    %263 = arith.extf %262 : vector<16x256xbf16> to vector<16x256xf32>
    %264 = arith.truncf %245 : vector<16x64xf32> to vector<16x64xbf16>
    %cst_82 = arith.constant dense<0.000000e+00> : vector<16x256xf32>
    %265 = tpu.matmul %264, %3, %cst_82 {dimension_numbers = #tpu.dot_dimension_numbers<[1], [0], [0], [1], [0, 0, 1, 1], [], []>} : vector<16x64xbf16>, vector<64x256xbf16>, vector<16x256xf32> -> vector<16x256xf32>
    %266 = arith.addf %263, %265 : vector<16x256xf32>
    %267 = vector.extract_strided_slice %266 {offsets = [0, 0], sizes = [16, 192], strides = [1, 1]} : vector<16x256xf32> to vector<16x192xf32>
    %268 = arith.negf %267 : vector<16x192xf32>
    %269 = math.exp %268 : vector<16x192xf32>
    %cst_83 = arith.constant 1.000000e+00 : f32
    %270 = vector.broadcast %cst_83 : f32 to vector<16x192xf32>
    %271 = arith.addf %270, %269 : vector<16x192xf32>
    %272 = arith.divf %270, %271 : vector<16x192xf32>
    %273 = vector.extract_strided_slice %272 {offsets = [0, 0], sizes = [16, 64], strides = [1, 1]} : vector<16x192xf32> to vector<16x64xf32>
    %274 = vector.extract_strided_slice %272 {offsets = [0, 64], sizes = [16, 64], strides = [1, 1]} : vector<16x192xf32> to vector<16x64xf32>
    %275 = vector.extract_strided_slice %272 {offsets = [0, 128], sizes = [16, 64], strides = [1, 1]} : vector<16x192xf32> to vector<16x64xf32>
    %276 = vector.extract_strided_slice %266 {offsets = [0, 192], sizes = [16, 64], strides = [1, 1]} : vector<16x256xf32> to vector<16x64xf32>
    %277 = math.tanh %276 : vector<16x64xf32>
    %278 = arith.mulf %274, %243 : vector<16x64xf32>
    %279 = arith.mulf %273, %277 : vector<16x64xf32>
    %280 = arith.addf %278, %279 : vector<16x64xf32>
    %281 = math.tanh %280 : vector<16x64xf32>
    %282 = arith.mulf %275, %281 : vector<16x64xf32>
    %c16_i32_84 = arith.constant 16 : i32
    %283 = arith.muli %c6_i32, %c16_i32_84 : i32
    %284 = tpu.assume_multiple %283, 16 : i32
    %285 = arith.truncf %282 : vector<16x64xf32> to vector<16x64xbf16>
    %c0_85 = arith.constant 0 : index
    %286 = arith.index_cast %284 : i32 to index
    %c0_86 = arith.constant 0 : index
    %287 = vector.load %arg7[%c0_85, %286, %c0_86] : memref<1x128x64xbf16, #tpu.memory_space<vmem>>, vector<1x16x64xbf16>
    %288 = vector.shape_cast %287 : vector<1x16x64xbf16> to vector<16x64xbf16>
    %289 = vector.shape_cast %285 : vector<16x64xbf16> to vector<1x16x64xbf16>
    tpu.vector_store %arg7[%c0_85, %286, %c0_86], %289 {strides = array<i32>} : memref<1x128x64xbf16, #tpu.memory_space<vmem>>, vector<1x16x64xbf16>,
    %c7_i32_87 = arith.constant 7 : i32
    %c16_i32_88 = arith.constant 16 : i32
    %290 = arith.muli %c7_i32_87, %c16_i32_88 : i32
    %291 = tpu.assume_multiple %290, 16 : i32
    %292 = arith.index_cast %291 : i32 to index
    %c0_89 = arith.constant 0 : index
    %293 = vector.load %arg8[%292, %c0_89] : memref<128x256xbf16, #tpu.memory_space<vmem>>, vector<16x256xbf16>
    %c7_i32_90 = arith.constant 7 : i32
    %294 = arith.subi %c7_i32_90, %c7_i32_87 : i32
    %c16_i32_91 = arith.constant 16 : i32
    %295 = arith.muli %294, %c16_i32_91 : i32
    %296 = tpu.assume_multiple %295, 16 : i32
    %297 = arith.index_cast %296 : i32 to index
    %c0_92 = arith.constant 0 : index
    %298 = vector.load %arg8[%297, %c0_92] : memref<128x256xbf16, #tpu.memory_space<vmem>>, vector<16x256xbf16>
    %299 = arith.select %30, %293, %298 : vector<16x256xi1>, vector<16x256xbf16>
    %300 = arith.extf %299 : vector<16x256xbf16> to vector<16x256xf32>
    %301 = arith.truncf %282 : vector<16x64xf32> to vector<16x64xbf16>
    %cst_93 = arith.constant dense<0.000000e+00> : vector<16x256xf32>
    %302 = tpu.matmul %301, %3, %cst_93 {dimension_numbers = #tpu.dot_dimension_numbers<[1], [0], [0], [1], [0, 0, 1, 1], [], []>} : vector<16x64xbf16>, vector<64x256xbf16>, vector<16x256xf32> -> vector<16x256xf32>
    %303 = arith.addf %300, %302 : vector<16x256xf32>
    %304 = vector.extract_strided_slice %303 {offsets = [0, 0], sizes = [16, 192], strides = [1, 1]} : vector<16x256xf32> to vector<16x192xf32>
    %305 = arith.negf %304 : vector<16x192xf32>
    %306 = math.exp %305 : vector<16x192xf32>
    %cst_94 = arith.constant 1.000000e+00 : f32
    %307 = vector.broadcast %cst_94 : f32 to vector<16x192xf32>
    %308 = arith.addf %307, %306 : vector<16x192xf32>
    %309 = arith.divf %307, %308 : vector<16x192xf32>
    %310 = vector.extract_strided_slice %309 {offsets = [0, 0], sizes = [16, 64], strides = [1, 1]} : vector<16x192xf32> to vector<16x64xf32>
    %311 = vector.extract_strided_slice %309 {offsets = [0, 64], sizes = [16, 64], strides = [1, 1]} : vector<16x192xf32> to vector<16x64xf32>
    %312 = vector.extract_strided_slice %309 {offsets = [0, 128], sizes = [16, 64], strides = [1, 1]} : vector<16x192xf32> to vector<16x64xf32>
    %313 = vector.extract_strided_slice %303 {offsets = [0, 192], sizes = [16, 64], strides = [1, 1]} : vector<16x256xf32> to vector<16x64xf32>
    %314 = math.tanh %313 : vector<16x64xf32>
    %315 = arith.mulf %311, %280 : vector<16x64xf32>
    %316 = arith.mulf %310, %314 : vector<16x64xf32>
    %317 = arith.addf %315, %316 : vector<16x64xf32>
    %318 = math.tanh %317 : vector<16x64xf32>
    %319 = arith.mulf %312, %318 : vector<16x64xf32>
    %c16_i32_95 = arith.constant 16 : i32
    %320 = arith.muli %c7_i32_87, %c16_i32_95 : i32
    %321 = tpu.assume_multiple %320, 16 : i32
    %322 = arith.truncf %319 : vector<16x64xf32> to vector<16x64xbf16>
    %c0_96 = arith.constant 0 : index
    %323 = arith.index_cast %321 : i32 to index
    %c0_97 = arith.constant 0 : index
    %324 = vector.load %arg7[%c0_96, %323, %c0_97] : memref<1x128x64xbf16, #tpu.memory_space<vmem>>, vector<1x16x64xbf16>
    %325 = vector.shape_cast %324 : vector<1x16x64xbf16> to vector<16x64xbf16>
    %326 = vector.shape_cast %322 : vector<16x64xbf16> to vector<1x16x64xbf16>
    tpu.vector_store %arg7[%c0_96, %323, %c0_97], %326 {strides = array<i32>} : memref<1x128x64xbf16, #tpu.memory_space<vmem>>, vector<1x16x64xbf16>,
    %c8_i32 = arith.constant 8 : i32
    %327 = tpu.iota {dimensions = array<i32: 1>} : vector<16x64xi32>
    %c32_i32_98 = arith.constant 32 : i32
    %328 = vector.broadcast %c32_i32_98 : i32 to vector<16x64xi32>
    %329 = arith.cmpi slt, %327, %328 : vector<16x64xi32>
    %c0_i32_99 = arith.constant 0 : i32
    %c16_i32_100 = arith.constant 16 : i32
    %330 = arith.muli %c0_i32_99, %c16_i32_100 : i32
    %331 = tpu.assume_multiple %330, 16 : i32
    %c7_i32_101 = arith.constant 7 : i32
    %332 = arith.subi %c7_i32_101, %c0_i32_99 : i32
    %c16_i32_102 = arith.constant 16 : i32
    %333 = arith.muli %332, %c16_i32_102 : i32
    %334 = tpu.assume_multiple %333, 16 : i32
    %c0_103 = arith.constant 0 : index
    %335 = arith.index_cast %331 : i32 to index
    %c0_104 = arith.constant 0 : index
    %336 = vector.load %arg7[%c0_103, %335, %c0_104] : memref<1x128x64xbf16, #tpu.memory_space<vmem>>, vector<1x16x64xbf16>
    %337 = vector.shape_cast %336 : vector<1x16x64xbf16> to vector<16x64xbf16>
    %c0_105 = arith.constant 0 : index
    %338 = arith.index_cast %334 : i32 to index
    %c0_106 = arith.constant 0 : index
    %339 = vector.load %arg7[%c0_105, %338, %c0_106] : memref<1x128x64xbf16, #tpu.memory_space<vmem>>, vector<1x16x64xbf16>
    %340 = vector.shape_cast %339 : vector<1x16x64xbf16> to vector<16x64xbf16>
    %341 = arith.select %329, %337, %340 : vector<16x64xi1>, vector<16x64xbf16>
    %c0_107 = arith.constant 0 : index
    %342 = arith.index_cast %331 : i32 to index
    %c0_108 = arith.constant 0 : index
    %343 = vector.load %arg7[%c0_107, %342, %c0_108] : memref<1x128x64xbf16, #tpu.memory_space<vmem>>, vector<1x16x64xbf16>
    %344 = vector.shape_cast %343 : vector<1x16x64xbf16> to vector<16x64xbf16>
    %345 = vector.shape_cast %341 : vector<16x64xbf16> to vector<1x16x64xbf16>
    tpu.vector_store %arg7[%c0_107, %342, %c0_108], %345 {strides = array<i32>} : memref<1x128x64xbf16, #tpu.memory_space<vmem>>, vector<1x16x64xbf16>,
    %346 = arith.select %329, %340, %337 : vector<16x64xi1>, vector<16x64xbf16>
    %c0_109 = arith.constant 0 : index
    %347 = arith.index_cast %334 : i32 to index
    %c0_110 = arith.constant 0 : index
    %348 = vector.load %arg7[%c0_109, %347, %c0_110] : memref<1x128x64xbf16, #tpu.memory_space<vmem>>, vector<1x16x64xbf16>
    %349 = vector.shape_cast %348 : vector<1x16x64xbf16> to vector<16x64xbf16>
    %350 = vector.shape_cast %346 : vector<16x64xbf16> to vector<1x16x64xbf16>
    tpu.vector_store %arg7[%c0_109, %347, %c0_110], %350 {strides = array<i32>} : memref<1x128x64xbf16, #tpu.memory_space<vmem>>, vector<1x16x64xbf16>,
    %c1_i32_111 = arith.constant 1 : i32
    %c16_i32_112 = arith.constant 16 : i32
    %351 = arith.muli %c1_i32_111, %c16_i32_112 : i32
    %352 = tpu.assume_multiple %351, 16 : i32
    %c7_i32_113 = arith.constant 7 : i32
    %353 = arith.subi %c7_i32_113, %c1_i32_111 : i32
    %c16_i32_114 = arith.constant 16 : i32
    %354 = arith.muli %353, %c16_i32_114 : i32
    %355 = tpu.assume_multiple %354, 16 : i32
    %c0_115 = arith.constant 0 : index
    %356 = arith.index_cast %352 : i32 to index
    %c0_116 = arith.constant 0 : index
    %357 = vector.load %arg7[%c0_115, %356, %c0_116] : memref<1x128x64xbf16, #tpu.memory_space<vmem>>, vector<1x16x64xbf16>
    %358 = vector.shape_cast %357 : vector<1x16x64xbf16> to vector<16x64xbf16>
    %c0_117 = arith.constant 0 : index
    %359 = arith.index_cast %355 : i32 to index
    %c0_118 = arith.constant 0 : index
    %360 = vector.load %arg7[%c0_117, %359, %c0_118] : memref<1x128x64xbf16, #tpu.memory_space<vmem>>, vector<1x16x64xbf16>
    %361 = vector.shape_cast %360 : vector<1x16x64xbf16> to vector<16x64xbf16>
    %362 = arith.select %329, %358, %361 : vector<16x64xi1>, vector<16x64xbf16>
    %c0_119 = arith.constant 0 : index
    %363 = arith.index_cast %352 : i32 to index
    %c0_120 = arith.constant 0 : index
    %364 = vector.load %arg7[%c0_119, %363, %c0_120] : memref<1x128x64xbf16, #tpu.memory_space<vmem>>, vector<1x16x64xbf16>
    %365 = vector.shape_cast %364 : vector<1x16x64xbf16> to vector<16x64xbf16>
    %366 = vector.shape_cast %362 : vector<16x64xbf16> to vector<1x16x64xbf16>
    tpu.vector_store %arg7[%c0_119, %363, %c0_120], %366 {strides = array<i32>} : memref<1x128x64xbf16, #tpu.memory_space<vmem>>, vector<1x16x64xbf16>,
    %367 = arith.select %329, %361, %358 : vector<16x64xi1>, vector<16x64xbf16>
    %c0_121 = arith.constant 0 : index
    %368 = arith.index_cast %355 : i32 to index
    %c0_122 = arith.constant 0 : index
    %369 = vector.load %arg7[%c0_121, %368, %c0_122] : memref<1x128x64xbf16, #tpu.memory_space<vmem>>, vector<1x16x64xbf16>
    %370 = vector.shape_cast %369 : vector<1x16x64xbf16> to vector<16x64xbf16>
    %371 = vector.shape_cast %367 : vector<16x64xbf16> to vector<1x16x64xbf16>
    tpu.vector_store %arg7[%c0_121, %368, %c0_122], %371 {strides = array<i32>} : memref<1x128x64xbf16, #tpu.memory_space<vmem>>, vector<1x16x64xbf16>,
    %c2_i32_123 = arith.constant 2 : i32
    %c16_i32_124 = arith.constant 16 : i32
    %372 = arith.muli %c2_i32_123, %c16_i32_124 : i32
    %373 = tpu.assume_multiple %372, 16 : i32
    %c7_i32_125 = arith.constant 7 : i32
    %374 = arith.subi %c7_i32_125, %c2_i32_123 : i32
    %c16_i32_126 = arith.constant 16 : i32
    %375 = arith.muli %374, %c16_i32_126 : i32
    %376 = tpu.assume_multiple %375, 16 : i32
    %c0_127 = arith.constant 0 : index
    %377 = arith.index_cast %373 : i32 to index
    %c0_128 = arith.constant 0 : index
    %378 = vector.load %arg7[%c0_127, %377, %c0_128] : memref<1x128x64xbf16, #tpu.memory_space<vmem>>, vector<1x16x64xbf16>
    %379 = vector.shape_cast %378 : vector<1x16x64xbf16> to vector<16x64xbf16>
    %c0_129 = arith.constant 0 : index
    %380 = arith.index_cast %376 : i32 to index
    %c0_130 = arith.constant 0 : index
    %381 = vector.load %arg7[%c0_129, %380, %c0_130] : memref<1x128x64xbf16, #tpu.memory_space<vmem>>, vector<1x16x64xbf16>
    %382 = vector.shape_cast %381 : vector<1x16x64xbf16> to vector<16x64xbf16>
    %383 = arith.select %329, %379, %382 : vector<16x64xi1>, vector<16x64xbf16>
    %c0_131 = arith.constant 0 : index
    %384 = arith.index_cast %373 : i32 to index
    %c0_132 = arith.constant 0 : index
    %385 = vector.load %arg7[%c0_131, %384, %c0_132] : memref<1x128x64xbf16, #tpu.memory_space<vmem>>, vector<1x16x64xbf16>
    %386 = vector.shape_cast %385 : vector<1x16x64xbf16> to vector<16x64xbf16>
    %387 = vector.shape_cast %383 : vector<16x64xbf16> to vector<1x16x64xbf16>
    tpu.vector_store %arg7[%c0_131, %384, %c0_132], %387 {strides = array<i32>} : memref<1x128x64xbf16, #tpu.memory_space<vmem>>, vector<1x16x64xbf16>,
    %388 = arith.select %329, %382, %379 : vector<16x64xi1>, vector<16x64xbf16>
    %c0_133 = arith.constant 0 : index
    %389 = arith.index_cast %376 : i32 to index
    %c0_134 = arith.constant 0 : index
    %390 = vector.load %arg7[%c0_133, %389, %c0_134] : memref<1x128x64xbf16, #tpu.memory_space<vmem>>, vector<1x16x64xbf16>
    %391 = vector.shape_cast %390 : vector<1x16x64xbf16> to vector<16x64xbf16>
    %392 = vector.shape_cast %388 : vector<16x64xbf16> to vector<1x16x64xbf16>
    tpu.vector_store %arg7[%c0_133, %389, %c0_134], %392 {strides = array<i32>} : memref<1x128x64xbf16, #tpu.memory_space<vmem>>, vector<1x16x64xbf16>,
    %c3_i32_135 = arith.constant 3 : i32
    %c16_i32_136 = arith.constant 16 : i32
    %393 = arith.muli %c3_i32_135, %c16_i32_136 : i32
    %394 = tpu.assume_multiple %393, 16 : i32
    %c7_i32_137 = arith.constant 7 : i32
    %395 = arith.subi %c7_i32_137, %c3_i32_135 : i32
    %c16_i32_138 = arith.constant 16 : i32
    %396 = arith.muli %395, %c16_i32_138 : i32
    %397 = tpu.assume_multiple %396, 16 : i32
    %c0_139 = arith.constant 0 : index
    %398 = arith.index_cast %394 : i32 to index
    %c0_140 = arith.constant 0 : index
    %399 = vector.load %arg7[%c0_139, %398, %c0_140] : memref<1x128x64xbf16, #tpu.memory_space<vmem>>, vector<1x16x64xbf16>
    %400 = vector.shape_cast %399 : vector<1x16x64xbf16> to vector<16x64xbf16>
    %c0_141 = arith.constant 0 : index
    %401 = arith.index_cast %397 : i32 to index
    %c0_142 = arith.constant 0 : index
    %402 = vector.load %arg7[%c0_141, %401, %c0_142] : memref<1x128x64xbf16, #tpu.memory_space<vmem>>, vector<1x16x64xbf16>
    %403 = vector.shape_cast %402 : vector<1x16x64xbf16> to vector<16x64xbf16>
    %404 = arith.select %329, %400, %403 : vector<16x64xi1>, vector<16x64xbf16>
    %c0_143 = arith.constant 0 : index
    %405 = arith.index_cast %394 : i32 to index
    %c0_144 = arith.constant 0 : index
    %406 = vector.load %arg7[%c0_143, %405, %c0_144] : memref<1x128x64xbf16, #tpu.memory_space<vmem>>, vector<1x16x64xbf16>
    %407 = vector.shape_cast %406 : vector<1x16x64xbf16> to vector<16x64xbf16>
    %408 = vector.shape_cast %404 : vector<16x64xbf16> to vector<1x16x64xbf16>
    tpu.vector_store %arg7[%c0_143, %405, %c0_144], %408 {strides = array<i32>} : memref<1x128x64xbf16, #tpu.memory_space<vmem>>, vector<1x16x64xbf16>,
    %409 = arith.select %329, %403, %400 : vector<16x64xi1>, vector<16x64xbf16>
    %c0_145 = arith.constant 0 : index
    %410 = arith.index_cast %397 : i32 to index
    %c0_146 = arith.constant 0 : index
    %411 = vector.load %arg7[%c0_145, %410, %c0_146] : memref<1x128x64xbf16, #tpu.memory_space<vmem>>, vector<1x16x64xbf16>
    %412 = vector.shape_cast %411 : vector<1x16x64xbf16> to vector<16x64xbf16>
    %413 = vector.shape_cast %409 : vector<16x64xbf16> to vector<1x16x64xbf16>
    tpu.vector_store %arg7[%c0_145, %410, %c0_146], %413 {strides = array<i32>} : memref<1x128x64xbf16, #tpu.memory_space<vmem>>, vector<1x16x64xbf16>,
    %c4_i32_147 = arith.constant 4 : i32
    return
  }
  func.func @transform_0(%arg0: i32) -> (i32, i32, i32) {
    %c0_i32 = arith.constant 0 : i32
    %c0_i32_0 = arith.constant 0 : i32
    %c0_i32_1 = arith.constant 0 : i32
    return %arg0, %c0_i32, %c0_i32_0 : i32, i32, i32
  }
  func.func @transform_1(%arg0: i32) -> (i32, i32) {
    %c0_i32 = arith.constant 0 : i32
    %c0_i32_0 = arith.constant 0 : i32
    %c0_i32_1 = arith.constant 0 : i32
    return %c0_i32, %c0_i32_0 : i32, i32
  }
  func.func @transform_2(%arg0: i32) -> (i32, i32) {
    %c0_i32 = arith.constant 0 : i32
    %c0_i32_0 = arith.constant 0 : i32
    %c0_i32_1 = arith.constant 0 : i32
    return %c0_i32, %c0_i32_0 : i32, i32
  }
  func.func @transform_3(%arg0: i32) -> (i32, i32) {
    %c0_i32 = arith.constant 0 : i32
    %c0_i32_0 = arith.constant 0 : i32
    %c0_i32_1 = arith.constant 0 : i32
    return %c0_i32, %c0_i32_0 : i32, i32
  }
  func.func @transform_4(%arg0: i32) -> (i32, i32) {
    %c0_i32 = arith.constant 0 : i32
    %c0_i32_0 = arith.constant 0 : i32
    return %arg0, %c0_i32 : i32, i32
  }
  func.func @transform_5(%arg0: i32) -> (i32, i32) {
    %c0_i32 = arith.constant 0 : i32
    %c0_i32_0 = arith.constant 0 : i32
    return %arg0, %c0_i32 : i32, i32
  }
  func.func @transform_6(%arg0: i32) -> (i32, i32, i32) {
    %c0_i32 = arith.constant 0 : i32
    %c0_i32_0 = arith.constant 0 : i32
    %c0_i32_1 = arith.constant 0 : i32
    return %arg0, %c0_i32, %c0_i32_0 : i32, i32, i32
  }
}

</mosaic_0001>

<bundles_post_ra>
// kernel: tpu_custom_call.1
= control target key start
LH: loop header
LB: loop body
LE: loop exit
PB: predicated region body
PF: predicated region fallthrough
CT: control target
= control target key end

     0   :  { %11 = vsyncpa [#allocation4], 0  ;;  %s2787_s0 = inlined_call_operand.vmem [shape: bf16[1,128,16], index: 0, kind: input, shape index: {}]   ;;  %s2788_s1 = inlined_call_operand.hbm [shape: bf16[16,256], index: 1, kind: input, shape index: {}]   ;;  %s2789_s2 = inlined_call_operand.vmem [shape: bf16[64,256], index: 2, kind: input, shape index: {}]   ;;  %s2790_s3 = inlined_call_operand.hbm [shape: f32[1,256], index: 3, kind: input, shape index: {}]   ;;  %s2791_s4 = inlined_call_operand.hbm [shape: f32[16,64], index: 4, kind: input, shape index: {}]   ;;  %s2792_s5 = inlined_call_operand.vmem [shape: f32[16,64], index: 5, kind: input, shape index: {}]   ;;  %s2793_s6 = inlined_call_operand.vmem [shape: bf16[1,128,64], index: 6, kind: output, shape index: {}]  }
   0x1   :  { %12 = vsyncpa [#allocation6], 0  ;;  %s2085_s21 = smov [#allocation5]   ;;  %s2086_s23 = smov [#allocation3]  }
   0x2   :  { %s35_s22 = sshll.u32 %s2085_s21, 4  ;;  %s20_s24 = sshll.u32 %s2086_s23, 4  ;;  %s36_s22 = int_to_ptr.vmem [resolvable:$true] %s35_s22  ;;  %s21_s24 = int_to_ptr.vmem [resolvable:$true] %s20_s24 }
   0x3   :  { %s2029_s25 = scalar_lea.vmem %s36_s22, 32  ;;  %p2034_p1 = scmp.lt.s32.totalorder %s36_s22, %s36_s22 }
   0x4   :  { %p2030_p0 = scmp.ne.s32.totalorder %s36_s22, %s2029_s25  ;;  %p2035_p2 = scmp.lt.s32.totalorder %s2029_s25, %s2029_s25 }
   0x6   :  { %p2036_p3 = por %p2035_p2, %p2034_p1 }
   0x8   :  { %p2037_p4 = pnand %p2036_p3, %p2030_p0 }
   0xa   :  { %2040 = shalt.err (!%p2037_p4)
}
   0xb   :  { %38 = dma.hbm_to_vmem [thread:$0]  %s2790_s3, 32, %s36_s22, [#allocation6]  }
   0xc   :  { %s2049_s28 = scalar_lea.vmem %s21_s24, 256  ;;  %p2054_p6 = scmp.lt.s32.totalorder %s21_s24, %s21_s24 }
   0xd   :  { %p2050_p5 = scmp.ne.s32.totalorder %s21_s24, %s2049_s28  ;;  %p2055_p7 = scmp.lt.s32.totalorder %s2049_s28, %s2049_s28 }
   0xf   :  { %p2056_p8 = por %p2055_p7, %p2054_p6 }
  0x11   :  { %p2057_p9 = pnand %p2056_p8, %p2050_p5 }
  0x13   :  { %2060 = shalt.err (!%p2057_p9)
}
  0x14   :  { %s2087_s29 = smov 128   ;;  %s2088_s30 = smov 8  }
  0x15   :  { %26 = dma.hbm_to_vmem [thread:$0]  %s2788_s1, 256, %s21_s24, [#allocation4], %s2087_s29, %s2087_s29, %s2088_s30  }
  0x16   :  { %s2089_s9 = smov [#allocation7]  }
  0x17   :  { %s44_s10 = sshll.u32 %s2089_s9, 4  ;;  %s45_s10 = int_to_ptr.vmem [resolvable:$true] %s44_s10 }
  0x18   :  { %s2069_s11 = scalar_lea.vmem %s45_s10, 256  ;;  %p2074_p11 = scmp.lt.s32.totalorder %s45_s10, %s45_s10 }
  0x19   :  { %p2070_p10 = scmp.ne.s32.totalorder %s45_s10, %s2069_s11  ;;  %p2075_p12 = scmp.lt.s32.totalorder %s2069_s11, %s2069_s11 }
  0x1b   :  { %p2076_p13 = por %p2075_p12, %p2074_p11 }
  0x1d   :  { %p2077_p0 = pnand %p2076_p13, %p2070_p10 }
  0x1f   :  { %2080 = shalt.err (!%p2077_p0)
}
  0x20   :  { %50 = dma.hbm_to_vmem [thread:$0]  %s2791_s4, 256, %s45_s10, [#allocation6], %s2087_s29, %s2087_s29, %s2088_s30  }
  0x21   :  { %2081 = dma.done.wait [#allocation4], 256  }
  0x22   :  { %2082 = vsyncadd [#allocation4], 4294967040 }
  0x23   :  { %2083 = dma.done.wait [#allocation6], 288  }
  0x24   :  { %2084 = vsyncadd [#allocation6], 4294967008  ;;  %v2090_v0 = vmov 0   ;;  %v1799_v1 = vld [vmem:[#allocation3 + $0x4] ss:$8 sps:$4 sm:$0xff]   ;;  %v1802_v3 = vld [vmem:[%s2787_s0] sm:$0xff]   ;;  %v95_v24 = vlaneseq }
  0x25   :  { %212 = vmatprep.mubr.bf16.mxu0 %v2090_v0  ;;  %528 = vmatprep.mubr.bf16.mxu1 %v2090_v0  ;;  %v1801_v2 = vld [vmem:[#allocation3] ss:$8 sps:$4 sm:$0xff]   ;;  %vm155_vm0 = vcmask 130048   ;;  %v2146_v4 = vld [vmem:[%s2789_s2 + $0x34] ss:$8 sps:$4 sm:$0xff]   ;;  %v1803_v7 = vld [vmem:[%s2787_s0 + $0x8] sm:$0xff]  }
  0x26   :  { %194 = vmatprep.subr.bf16.mxu0 %v1799_v1  ;;  %v2151_v5 = vld [vmem:[%s2789_s2 + $0x30] ss:$8 sps:$4 sm:$0xff]   ;;  %v2156_v6 = vld [vmem:[%s2789_s2 + $0x24] ss:$8 sps:$4 sm:$0xff]   ;;  %504 = vmatprep.subr.bf16.mxu1 %v2146_v4  ;;  %v2167_v8 = vld [vmem:[%s2789_s2 + $0x20] ss:$8 sps:$4 sm:$0xff]  }
  0x27   :  { %195 = vmatpush1.bf16.msra.mxu0 %v1801_v2  ;;  %505 = vmatpush1.bf16.msra.mxu1 %v2151_v5  ;;  %v2174_v9 = vld [vmem:[%s2789_s2 + $0x14] ss:$8 sps:$4 sm:$0xff]   ;;  %v2183_v10 = vld [vmem:[%s2789_s2 + $0x10] ss:$8 sps:$4 sm:$0xff]   ;;  %v92_v11 = vld [vmem:[%s2792_s5] sm:$0xff]  ;;  %s2091_s7 = smov 64  }
  0x28   :  { %1054 = vmatprep.subr.bf16.mxu0 %v2146_v4  ;;  %506 = vmatprep.subr.bf16.mxu1 %v2156_v6  ;;  %v2192_v12 = vld [vmem:[%s2789_s2 + $0x4] ss:$8 sps:$4 sm:$0xff]   ;;  %v1804_v14 = vld [vmem:[%s2787_s0 + $0x10] sm:$0xff]   ;;  %v2207_v15 = vld [vmem:[%s2789_s2] ss:$8 sps:$4 sm:$0xff]   ;;  %vm492_vm1 = vcmask 523264  }
  0x29   :  { %571 = vrot.lane.b32.xlu1 %v92_v11, %s2091_s7  ;;  %v93_v13 = vld [vmem:[%s2792_s5 + $0x8] sm:$0xff]  ;;  %v1805_v19 = vld [vmem:[%s2787_s0 + $0x18] sm:$0xff]   ;;  %v1806_v20 = vld [vmem:[%s2787_s0 + $0x20] sm:$0xff]   ;;  %v96_v25 = vshrl.u32 %v95_v24, 7  ;;  %v2277_v52 = vand.u32 127, %v95_v24  ;;  %vm619_vm5 = vcmask 519168  }
  0x2a   :  { %1630 = vmatmul.mubr.msk.bf16.vlgmr.msra.gmra.mxu0 %vm155_vm0, %v1802_v3  ;;  %v90_v16 = vld [vmem:[#allocation7] sm:$0xff]  ;;  %v91_v17 = vld [vmem:[#allocation7 + $0x8] sm:$0xff]  ;;  %v1821_v23 = vld [vmem:[%s2787_s0 + $0x38] sm:$0xff]  }
  0x2b   :  { %222 = vmatprep.mubr.bf16.mxu0 %v2090_v0  ;;  %1055 = vmatpush1.bf16.msra.mxu0 %v2151_v5  ;;  %v451_v18 = vpack.c.bf16 %v91_v17, %v90_v16  ;;  %v1807_v21 = vld [vmem:[%s2787_s0 + $0x28] sm:$0xff]   ;;  %v1814_v22 = vld [vmem:[%s2787_s0 + $0x30] sm:$0xff]   ;;  %v97_v28 = vsub.s32 0, %v96_v25  ;;  %v89_v29 = vld [vmem:[#allocation5] sm:$0x3]  ;;  %v101_v31 = vsub.s32 1, %v96_v25 }
  0x2c   :  { %1056 = vmatprep.subr.bf16.mxu0 %v2156_v6  ;;  %507 = vmatpush1.bf16.msra.mxu1 %v2167_v8  ;;  %v407_v58 = vadd.s32 128, %v2277_v52  ;;  %v412_v1 = vand.u32 63, %v2277_v52  ;;  %vm1557_vm6 = vcmp.lt.s32.totalorder %v2277_v52, 32  ;;  %v2015_v52 = vld [vmem:[%s2789_s2 + $0x24] ss:$8 sps:$4 sm:$0xff]  }
  0x2d   :  { %508 = vmatprep.subr.bf16.mxu1 %v2174_v9  ;;  %573 = vrot.lane.b32.xlu1 %v93_v13, %s2091_s7  ;;  %v2262_v33 = vrot.slane %v89_v29, %v97_v28  ;;  %v2264_v35 = vrot.slane %v89_v29, %v101_v31  ;;  %vm2543_vm7 = vmpackc.low %vm1557_vm6, %vm1557_vm6 }
  0x2e   :  { %v419_v2 = vand.u32 63, %v407_v58  ;;  %vm432_vm2 = vcmp.lt.s32.totalorder %v412_v1, 32 }
  0x2f   :  { %1057 = vmatpush1.bf16.msra.mxu0 %v2167_v8 }
  0x30   :  { %1058 = vmatprep.subr.bf16.mxu0 %v2174_v9  ;;  %509 = vmatpush1.bf16.msra.mxu1 %v2183_v10  ;;  %vm433_vm3 = vcmp.lt.s32.totalorder %v419_v2, 32 }
  0x31   :  { %510 = vmatprep.subr.bf16.mxu1 %v2192_v12  ;;  %vm2288_vm4 = vmpackc.low %vm433_vm3, %vm432_vm2 }
  0x32   :  { %1631 = vmatmul.mubr.msk.bf16.gmra.mxu0 %vm155_vm0, %v1803_v7 }
  0x33   :  { %232 = vmatprep.mubr.bf16.mxu0 %v2090_v0  ;;  %1059 = vmatpush1.bf16.msra.mxu0 %v2183_v10 }
  0x34   :  { %1060 = vmatprep.subr.bf16.mxu0 %v2192_v12  ;;  %511 = vmatpush1.bf16.msra.mxu1 %v2207_v15 }
  0x35   :  { %649 = vmatprep.subr.bf16.mxu1 %v2146_v4 }
  0x37   :  { %1061 = vmatpush1.bf16.msra.mxu0 %v2207_v15  ;;  %1662 = vmatmul.mubr.msk.bf16.vlgmr.msra.gmra.mxu1 %vm492_vm1, %v451_v18 }
  0x38   :  { %1316 = vmatprep.subr.bf16.mxu0 %v2146_v4  ;;  %650 = vmatpush1.bf16.msra.mxu1 %v2151_v5 }
  0x39   :  { %673 = vmatprep.mubr.bf16.mxu1 %v2090_v0  ;;  %651 = vmatprep.subr.bf16.mxu1 %v2156_v6 }
  0x3a   :  { %1632 = vmatmul.mubr.msk.bf16.gmra.mxu0 %vm155_vm0, %v1804_v14 }
  0x3b   :  { %242 = vmatprep.mubr.bf16.mxu0 %v2090_v0 }
  0x3c   :  { %652 = vmatpush1.bf16.msra.mxu1 %v2167_v8 }
  0x3d   :  { %653 = vmatprep.subr.bf16.mxu1 %v2174_v9 }
  0x40   :  { %654 = vmatpush1.bf16.msra.mxu1 %v2183_v10 }
  0x41   :  { %655 = vmatprep.subr.bf16.mxu1 %v2192_v12 }
  0x42   :  { %1633 = vmatmul.mubr.msk.bf16.gmra.mxu0 %vm155_vm0, %v1805_v19 }
  0x43   :  { %252 = vmatprep.mubr.bf16.mxu0 %v2090_v0 }
  0x44   :  { %656 = vmatpush1.bf16.msra.mxu1 %v2207_v15 }
  0x45   :  { %786 = vmatprep.subr.bf16.mxu1 %v2146_v4 }
  0x4a   :  { %1634 = vmatmul.mubr.msk.bf16.gmra.mxu0 %vm155_vm0, %v1806_v20 }
  0x4b   :  { %262 = vmatprep.mubr.bf16.mxu0 %v2090_v0 }
  0x52   :  { %1635 = vmatmul.mubr.msk.bf16.gmra.mxu0 %vm155_vm0, %v1807_v21 }
  0x53   :  { %272 = vmatprep.mubr.bf16.mxu0 %v2090_v0 }
  0x5a   :  { %1636 = vmatmul.mubr.msk.bf16.gmra.mxu0 %vm155_vm0, %v1814_v22 }
  0x5b   :  { %282 = vmatprep.mubr.bf16.mxu0 %v2090_v0 }
  0x62   :  { %1637 = vmatmul.mubr.msk.bf16.gmra.mxu0 %vm155_vm0, %v1821_v23 }
  0x63   :  { %1078 = vmatprep.mubr.bf16.mxu0 %v2090_v0 }
  0xea   :  { %v2254_v26 = vpop.f32.mrf.mxu0 }
  0xec   :  { %v2256_v27 = vpop.f32.mrf.mxu0 }
  0xee   :  { %v2258_v30 = vpop.f32.mrf.mxu0 }
  0xf0   :  { %v2260_v32 = vpop.f32.mrf.mxu0 }
  0xf2   :  { %v224_v34 = vpop.f32.mrf.mxu0 }
  0xf3   :  { %v225_v36 = vadd.f32 %v224_v34, %v2262_v33 }
  0xf4   :  { %v226_v37 = vpop.f32.mrf.mxu0 }
  0xf5   :  { %v227_v38 = vadd.f32 %v226_v37, %v2264_v35 }
  0xf6   :  { %v228_v39 = vpop.f32.mrf.mxu0 }
  0xf7   :  { %v2268_v40 = vpack.c.bf16 %v227_v38, %v225_v36  ;;  %v229_v41 = vadd.f32 %v228_v39, %v2262_v33 }
  0xf8   :  { %v230_v42 = vpop.f32.mrf.mxu0 }
  0xf9   :  { %v231_v43 = vadd.f32 %v230_v42, %v2264_v35 }
  0xfa   :  { %v234_v44 = vpop.f32.mrf.mxu0 }
  0xfb   :  { %v2272_v45 = vpack.c.bf16 %v231_v43, %v229_v41  ;;  %v235_v46 = vadd.f32 %v234_v44, %v2262_v33 }
  0xfc   :  { %v236_v47 = vpop.f32.mrf.mxu0 }
  0xfd   :  { %v237_v48 = vadd.f32 %v236_v47, %v2264_v35 }
  0xfe   :  { %v238_v49 = vpop.f32.mrf.mxu0 }
  0xff   :  { %v1764_v50 = vpack.c.bf16 %v237_v48, %v235_v46  ;;  %v239_v51 = vadd.f32 %v238_v49, %v2262_v33 }
 0x100   :  { %v240_v53 = vpop.f32.mrf.mxu0 }
 0x101   :  { %v241_v54 = vadd.f32 %v240_v53, %v2264_v35 }
 0x102   :  { %v244_v55 = vpop.f32.mrf.mxu0 }
 0x103   :  { %v1765_v56 = vpack.c.bf16 %v241_v54, %v239_v51  ;;  %v245_v57 = vadd.f32 %v244_v55, %v2262_v33 }
 0x104   :  { %v246_v59 = vpop.f32.mrf.mxu0 }
 0x105   :  { %v247_v60 = vadd.f32 %v246_v59, %v2264_v35 }
 0x106   :  { %v248_v61 = vpop.f32.mrf.mxu0 }
 0x107   :  { %v1766_v62 = vpack.c.bf16 %v247_v60, %v245_v57  ;;  %v249_v63 = vadd.f32 %v248_v61, %v2262_v33 }
 0x108   :  { %v250_v3 = vpop.f32.mrf.mxu0 }
 0x109   :  { %v251_v7 = vadd.f32 %v250_v3, %v2264_v35  ;;  %v215_v3 = vadd.f32 %v2254_v26, %v2262_v33  ;;  %v221_v26 = vadd.f32 %v2260_v32, %v2264_v35 }
 0x10a   :  { %v254_v11 = vpop.f32.mrf.mxu0 }
 0x10b   :  { %v1767_v13 = vpack.c.bf16 %v251_v7, %v249_v63  ;;  %v255_v14 = vadd.f32 %v254_v11, %v2262_v33  ;;  %v530_v7 = vpop.f32.mrf.mxu1 }
 0x10c   :  { %v256_v16 = vpop.f32.mrf.mxu0 }
 0x10d   :  { %v257_v17 = vadd.f32 %v256_v16, %v2264_v35 }
 0x10e   :  { %v258_v18 = vpop.f32.mrf.mxu0 }
 0x10f   :  { %v1768_v20 = vpack.c.bf16 %v257_v17, %v255_v14  ;;  %v259_v21 = vadd.f32 %v258_v18, %v2262_v33 }
 0x110   :  { %v260_v22 = vpop.f32.mrf.mxu0 }
 0x111   :  { %v261_v23 = vadd.f32 %v260_v22, %v2264_v35  ;;  %v2296_v24 = vsel %vm2288_vm4, %v1766_v62, %v1768_v20  ;;  %v2300_v25 = vsel %vm2288_vm4, %v1768_v20, %v1766_v62  ;;  %v219_v20 = vadd.f32 %v2258_v30, %v2262_v33 }
 0x112   :  { %v264_v28 = vpop.f32.mrf.mxu0 }
 0x113   :  { %v1769_v29 = vpack.c.bf16 %v261_v23, %v259_v21  ;;  %v265_v31 = vadd.f32 %v264_v28, %v2262_v33  ;;  %v532_v21 = vpop.f32.mrf.mxu1  ;;  %v1761_v32 = vpack.c.bf16 %v221_v26, %v219_v20 }
 0x114   :  { %v266_v34 = vpop.f32.mrf.mxu0 }
 0x115   :  { %v267_v36 = vadd.f32 %v266_v34, %v2264_v35  ;;  %v2306_v37 = vsel %vm2288_vm4, %v1767_v13, %v1769_v29  ;;  %v2310_v38 = vsel %vm2288_vm4, %v1769_v29, %v1767_v13  ;;  %v534_v30 = vpop.f32.mrf.mxu1 }
 0x116   :  { %v268_v39 = vpop.f32.mrf.mxu0 }
 0x117   :  { %v1770_v41 = vpack.c.bf16 %v267_v36, %v265_v31  ;;  %v269_v42 = vadd.f32 %v268_v39, %v2262_v33 }
 0x118   :  { %v270_v43 = vpop.f32.mrf.mxu0 }
 0x119   :  { %v271_v44 = vadd.f32 %v270_v43, %v2264_v35  ;;  %v2316_v46 = vsel %vm2288_vm4, %v1764_v50, %v1770_v41  ;;  %v2320_v47 = vsel %vm2288_vm4, %v1770_v41, %v1764_v50 }
 0x11a   :  { %v274_v48 = vpop.f32.mrf.mxu0 }
 0x11b   :  { %v1771_v49 = vpack.c.bf16 %v271_v44, %v269_v42  ;;  %v275_v51 = vadd.f32 %v274_v48, %v2262_v33  ;;  %v536_v44 = vpop.f32.mrf.mxu1 }
 0x11c   :  { %v276_v53 = vpop.f32.mrf.mxu0 }
 0x11d   :  { %v277_v54 = vadd.f32 %v276_v53, %v2264_v35  ;;  %v2326_v55 = vsel %vm2288_vm4, %v1765_v56, %v1771_v49  ;;  %v2330_v57 = vsel %vm2288_vm4, %v1771_v49, %v1765_v56  ;;  %v217_v56 = vadd.f32 %v2256_v27, %v2264_v35 }
 0x11e   :  { %v278_v58 = vpop.f32.mrf.mxu0 }
 0x11f   :  { %v1772_v59 = vpack.c.bf16 %v277_v54, %v275_v51  ;;  %v279_v50 = vadd.f32 %v278_v58, %v2262_v33  ;;  %v1760_v17 = vpack.c.bf16 %v217_v56, %v215_v3 }
 0x120   :  { %v280_v60 = vpop.f32.mrf.mxu0 }
 0x121   :  { %v281_v61 = vadd.f32 %v280_v60, %v2264_v35  ;;  %v2337_v62 = vsel %vm2288_vm4, %v2268_v40, %v1772_v59  ;;  %v2342_v63 = vsel %vm2288_vm4, %v1772_v59, %v2268_v40 }
 0x122   :  { %v284_v1 = vpop.f32.mrf.mxu0 }
 0x123   :  { %v1773_v2 = vpack.c.bf16 %v281_v61, %v279_v50  ;;  %v285_v13 = vadd.f32 %v284_v1, %v2262_v33 }
 0x124   :  { %v286_v11 = vpop.f32.mrf.mxu0 }
 0x125   :  { %v287_v14 = vadd.f32 %v286_v11, %v2264_v35  ;;  %v2353_v16 = vsel %vm2288_vm4, %v2272_v45, %v1773_v2  ;;  %v2358_v40 = vsel %vm2288_vm4, %v1773_v2, %v2272_v45  ;;  %v572_v11 = vpop.permute.xlu1 %571 }
 0x126   :  { %v288_v27 = vpop.f32.mrf.mxu0 }
 0x127   :  { %v1774_v18 = vpack.c.bf16 %v287_v14, %v285_v13  ;;  %v289_v28 = vadd.f32 %v288_v27, %v2262_v33 }
 0x128   :  { %v290_v22 = vpop.f32.mrf.mxu0 }
 0x129   :  { %v445_v23 = vsel %vm2288_vm4, %v1760_v17, %v1774_v18  ;;  %v291_v29 = vadd.f32 %v290_v22, %v2264_v35  ;;  %v2370_v45 = vsel %vm2288_vm4, %v1774_v18, %v1760_v17  ;;  %v574_v27 = vpop.permute.xlu1 %573 }
 0x12a   :  { %v447_v31 = vunpack.c.l.bf16 %v445_v23  ;;  %v448_v34 = vunpack.c.h.bf16 %v445_v23 }
 0x12b   :  { %v1775_v36 = vpack.c.bf16 %v291_v29, %v289_v28 }
 0x12c   :  { %v539_v39 = vadd.f32 %v530_v7, %v447_v31  ;;  %v540_v41 = vadd.f32 %v532_v21, %v448_v34 }
 0x12d   :  { %v446_v42 = vsel %vm2288_vm4, %v1761_v32, %v1775_v36  ;;  %v2376_v43 = vsel %vm2288_vm4, %v1775_v36, %v1761_v32 }
 0x12e   :  { %1822 = vtanh.f32 %v540_v41  ;;  %v449_v33 = vunpack.c.l.bf16 %v446_v42  ;;  %v450_v35 = vunpack.c.h.bf16 %v446_v42  ;;  %v1663_v54 = vmul.f32 -1.442695, %v539_v39 }
 0x12f   :  { %v1664_v23 = vmul.f32 -1.442695, %v540_v41 }
 0x130   :  { %v541_v48 = vadd.f32 %v534_v30, %v449_v33  ;;  %v542_v49 = vadd.f32 %v536_v44, %v450_v35 }
 0x132   :  { %1824 = vtanh.f32 %v542_v49  ;;  %v1665_v58 = vmul.f32 -1.442695, %v541_v48  ;;  %v1666_v28 = vmul.f32 -1.442695, %v542_v49  ;;  %v634_v49 = vunpack.c.l.bf16 %v2337_v62 }
 0x133   :  { %1826 = vpow2.f32 %v1663_v54  ;;  %v635_v54 = vunpack.c.h.bf16 %v2337_v62 }
 0x134   :  { %1828 = vpow2.f32 %v1665_v58 }
 0x13b   :  { %v1823_v51 = vpop.eup %1822 }
 0x13c   :  { %581 = vrot.lane.b32.xlu0 %v1823_v51, %s2091_s7 }
 0x13f   :  { %v1825_v53 = vpop.eup %1824 }
 0x140   :  { %583 = vrot.lane.b32.xlu0 %v1825_v53, %s2091_s7  ;;  %v1827_v19 = vpop.eup %1826 }
 0x141   :  { %v555_v59 = vadd.f32 1.0, %v1827_v19  ;;  %v1829_v50 = vpop.eup %1828 }
 0x142   :  { %v557_v60 = vadd.f32 1.0, %v1829_v50 }
 0x143   :  { %1830 = vrcp.f32 %v555_v59  ;;  %v636_v59 = vunpack.c.l.bf16 %v2353_v16 }
 0x144   :  { %1832 = vrcp.f32 %v557_v60 }
 0x150   :  { %v1831_v61 = vpop.eup %1830 }
 0x151   :  { %v1833_v2 = vpop.eup %1832  ;;  %v577_v13 = vmul.f32 %v1831_v61, %v572_v11 }
 0x152   :  { %v578_v26 = vmul.f32 %v1833_v2, %v574_v27 }
 0x1ae   :  { %v582_v1 = vpop.permute.xlu0 %581 }
 0x1af   :  { %v587_v56 = vmul.f32 %v1831_v61, %v582_v1  ;;  %v637_v61 = vunpack.c.h.bf16 %v2353_v16 }
 0x1b1   :  { %591 = vrot.lane.b32.xlu0 %v587_v56, %s2091_s7 }
 0x1b2   :  { %v584_v3 = vpop.permute.xlu0 %583 }
 0x1b3   :  { %v588_v7 = vmul.f32 %v1833_v2, %v584_v3 }
 0x1b5   :  { %593 = vrot.lane.b32.xlu1 %v588_v7, %s2091_s7 }
 0x223   :  { %v592_v14 = vpop.permute.xlu0 %591 }
 0x224   :  { %v2382_v17 = vadd.f32 %v592_v14, %v577_v13 }
 0x226   :  { %1834 = vtanh.f32 %v2382_v17 }
 0x227   :  { %v594_v18 = vpop.permute.xlu1 %593 }
 0x228   :  { %v2385_v20 = vadd.f32 %v594_v18, %v578_v26 }
 0x22a   :  { %1836 = vtanh.f32 %v2385_v20 }
 0x22b   :  { %1838 = vpow2.f32 %v1664_v23 }
 0x22c   :  { %1840 = vpow2.f32 %v1666_v28 }
 0x233   :  { %v1835_v21 = vpop.eup %1834 }
 0x234   :  { %603 = vrot.lane.b32.xlu0 %v1835_v21, %s2091_s7 }
 0x237   :  { %v1837_v22 = vpop.eup %1836 }
 0x238   :  { %605 = vrot.lane.b32.xlu1 %v1837_v22, %s2091_s7  ;;  %v1839_v29 = vpop.eup %1838 }
 0x239   :  { %v556_v31 = vadd.f32 1.0, %v1839_v29  ;;  %v1841_v34 = vpop.eup %1840 }
 0x23a   :  { %v558_v32 = vadd.f32 1.0, %v1841_v34 }
 0x23b   :  { %1842 = vrcp.f32 %v556_v31 }
 0x23c   :  { %1844 = vrcp.f32 %v558_v32 }
 0x248   :  { %v1843_v36 = vpop.eup %1842 }
 0x249   :  { %v1845_v33 = vpop.eup %1844 }
 0x2a6   :  { %v604_v39 = vpop.permute.xlu0 %603 }
 0x2a7   :  { %v609_v30 = vmul.f32 %v1843_v36, %v604_v39 }
 0x2a9   :  { %v1776_v42 = vpack.c.bf16 %v609_v30, %v609_v30 }
 0x2aa   :  { %v606_v41 = vpop.permute.xlu1 %605 }
 0x2ab   :  { %620 = vst.msk [vmem:[%s2793_s6] sm:$0xf] %vm619_vm5, %v1776_v42  ;;  %v610_v35 = vmul.f32 %v1845_v33, %v606_v41 }
 0x2ad   :  { %v611_v44 = vpack.c.bf16 %v610_v35, %v609_v30  ;;  %v1777_v48 = vpack.c.bf16 %v610_v35, %v610_v35 }
 0x2af   :  { %621 = vst.msk [vmem:[%s2793_s6 + $0x4] sm:$0xf] %vm619_vm5, %v1777_v48  ;;  %1669 = vmatmul.mubr.msk.bf16.vlgmr.msra.gmra.mxu1 %vm492_vm1, %v611_v44 }
 0x2b0   :  { %787 = vmatpush1.bf16.msra.mxu1 %v2151_v5  ;;  %810 = vmatprep.mubr.bf16.mxu1 %v2090_v0 }
 0x2b1   :  { %788 = vmatprep.subr.bf16.mxu1 %v2156_v6 }
 0x2b4   :  { %789 = vmatpush1.bf16.msra.mxu1 %v2167_v8 }
 0x2b5   :  { %790 = vmatprep.subr.bf16.mxu1 %v2174_v9 }
 0x2b8   :  { %791 = vmatpush1.bf16.msra.mxu1 %v2183_v10 }
 0x2b9   :  { %792 = vmatprep.subr.bf16.mxu1 %v2192_v12 }
 0x2bc   :  { %793 = vmatpush1.bf16.msra.mxu1 %v2207_v15 }
 0x2bd   :  { %923 = vmatprep.subr.bf16.mxu1 %v2146_v4 }
 0x36f   :  { %v675_v51 = vpop.f32.mrf.mxu1 }
 0x370   :  { %v684_v53 = vadd.f32 %v675_v51, %v634_v49 }
 0x371   :  { %v677_v58 = vpop.f32.mrf.mxu1 }
 0x372   :  { %v685_v19 = vadd.f32 %v677_v58, %v635_v54  ;;  %v1670_v7 = vmul.f32 -1.442695, %v684_v53 }
 0x373   :  { %v679_v50 = vpop.f32.mrf.mxu1 }
 0x374   :  { %v686_v60 = vadd.f32 %v679_v50, %v636_v59  ;;  %1846 = vtanh.f32 %v685_v19  ;;  %v1671_v42 = vmul.f32 -1.442695, %v685_v19  ;;  %v771_v50 = vunpack.c.l.bf16 %v2316_v46 }
 0x375   :  { %v681_v1 = vpop.f32.mrf.mxu1 }
 0x376   :  { %v687_v56 = vadd.f32 %v681_v1, %v637_v61  ;;  %v1672_v62 = vmul.f32 -1.442695, %v686_v60  ;;  %v772_v1 = vunpack.c.h.bf16 %v2316_v46 }
 0x378   :  { %1848 = vtanh.f32 %v687_v56 }
 0x379   :  { %1850 = vpow2.f32 %v1670_v7 }
 0x37a   :  { %1852 = vpow2.f32 %v1672_v62 }
 0x381   :  { %v1847_v2 = vpop.eup %1846 }
 0x382   :  { %718 = vrot.lane.b32.xlu0 %v1847_v2, %s2091_s7 }
 0x385   :  { %v1849_v3 = vpop.eup %1848 }
 0x386   :  { %720 = vrot.lane.b32.xlu1 %v1849_v3, %s2091_s7  ;;  %v1851_v11 = vpop.eup %1850  ;;  %v773_v3 = vunpack.c.l.bf16 %v2326_v55 }
 0x387   :  { %v700_v13 = vadd.f32 1.0, %v1851_v11  ;;  %v1853_v14 = vpop.eup %1852  ;;  %v774_v11 = vunpack.c.h.bf16 %v2326_v55 }
 0x388   :  { %v702_v27 = vadd.f32 1.0, %v1853_v14 }
 0x389   :  { %1854 = vrcp.f32 %v700_v13 }
 0x38a   :  { %1856 = vrcp.f32 %v702_v27 }
 0x396   :  { %v1855_v16 = vpop.eup %1854 }
 0x397   :  { %v1857_v21 = vpop.eup %1856  ;;  %v714_v28 = vmul.f32 %v1855_v16, %v2382_v17  ;;  %v1673_v17 = vmul.f32 -1.442695, %v687_v56 }
 0x398   :  { %v715_v34 = vmul.f32 %v1857_v21, %v2385_v20 }
 0x3f4   :  { %v719_v26 = vpop.permute.xlu0 %718 }
 0x3f5   :  { %v724_v18 = vmul.f32 %v1855_v16, %v719_v26 }
 0x3f7   :  { %728 = vrot.lane.b32.xlu0 %v724_v18, %s2091_s7 }
 0x3f8   :  { %v721_v22 = vpop.permute.xlu1 %720 }
 0x3f9   :  { %v725_v23 = vmul.f32 %v1857_v21, %v721_v22 }
 0x3fb   :  { %730 = vrot.lane.b32.xlu1 %v725_v23, %s2091_s7 }
 0x469   :  { %v729_v29 = vpop.permute.xlu0 %728 }
 0x46a   :  { %v2417_v31 = vadd.f32 %v729_v29, %v714_v28 }
 0x46c   :  { %1858 = vtanh.f32 %v2417_v31 }
 0x46d   :  { %v731_v32 = vpop.permute.xlu1 %730 }
 0x46e   :  { %v2421_v36 = vadd.f32 %v731_v32, %v715_v34 }
 0x470   :  { %1860 = vtanh.f32 %v2421_v36 }
 0x471   :  { %1862 = vpow2.f32 %v1671_v42 }
 0x472   :  { %1864 = vpow2.f32 %v1673_v17 }
 0x479   :  { %v1859_v39 = vpop.eup %1858 }
 0x47a   :  { %740 = vrot.lane.b32.xlu0 %v1859_v39, %s2091_s7 }
 0x47d   :  { %v1861_v30 = vpop.eup %1860 }
 0x47e   :  { %742 = vrot.lane.b32.xlu1 %v1861_v30, %s2091_s7  ;;  %v1863_v33 = vpop.eup %1862 }
 0x47f   :  { %v701_v41 = vadd.f32 1.0, %v1863_v33  ;;  %v1865_v35 = vpop.eup %1864 }
 0x480   :  { %v703_v20 = vadd.f32 1.0, %v1865_v35 }
 0x481   :  { %1866 = vrcp.f32 %v701_v41 }
 0x482   :  { %1868 = vrcp.f32 %v703_v20 }
 0x48e   :  { %v1867_v44 = vpop.eup %1866 }
 0x48f   :  { %v1869_v53 = vpop.eup %1868 }
 0x4ec   :  { %v741_v48 = vpop.permute.xlu0 %740 }
 0x4ed   :  { %v746_v49 = vmul.f32 %v1867_v44, %v741_v48 }
 0x4ef   :  { %v1778_v51 = vpack.c.bf16 %v746_v49, %v746_v49 }
 0x4f0   :  { %v743_v54 = vpop.permute.xlu1 %742 }
 0x4f1   :  { %1676 = vst.msk [vmem:[%s2793_s6 + $0x8] sm:$0xf] %vm619_vm5, %v1778_v51  ;;  %v747_v58 = vmul.f32 %v1869_v53, %v743_v54 }
 0x4f3   :  { %v748_v19 = vpack.c.bf16 %v747_v58, %v746_v49  ;;  %v1779_v59 = vpack.c.bf16 %v747_v58, %v747_v58 }
 0x4f5   :  { %1677 = vst.msk [vmem:[%s2793_s6 + $0xc] sm:$0xf] %vm619_vm5, %v1779_v59  ;;  %1678 = vmatmul.mubr.msk.bf16.vlgmr.msra.gmra.mxu1 %vm492_vm1, %v748_v19 }
 0x4f6   :  { %924 = vmatpush1.bf16.msra.mxu1 %v2151_v5  ;;  %947 = vmatprep.mubr.bf16.mxu1 %v2090_v0 }
 0x4f7   :  { %925 = vmatprep.subr.bf16.mxu1 %v2156_v6 }
 0x4fa   :  { %926 = vmatpush1.bf16.msra.mxu1 %v2167_v8 }
 0x4fb   :  { %927 = vmatprep.subr.bf16.mxu1 %v2174_v9 }
 0x4fe   :  { %928 = vmatpush1.bf16.msra.mxu1 %v2183_v10 }
 0x4ff   :  { %929 = vmatprep.subr.bf16.mxu1 %v2192_v12 }
 0x502   :  { %930 = vmatpush1.bf16.msra.mxu1 %v2207_v15 }
 0x503   :  { %1185 = vmatprep.subr.bf16.mxu1 %v2146_v4 }
 0x5b5   :  { %v812_v60 = vpop.f32.mrf.mxu1 }
 0x5b6   :  { %v821_v61 = vadd.f32 %v812_v60, %v771_v50 }
 0x5b7   :  { %v814_v56 = vpop.f32.mrf.mxu1 }
 0x5b8   :  { %v822_v2 = vadd.f32 %v814_v56, %v772_v1  ;;  %v1679_v26 = vmul.f32 -1.442695, %v821_v61 }
 0x5b9   :  { %v816_v7 = vpop.f32.mrf.mxu1 }
 0x5ba   :  { %v823_v62 = vadd.f32 %v816_v7, %v773_v3  ;;  %1870 = vtanh.f32 %v822_v2  ;;  %v1680_v48 = vmul.f32 -1.442695, %v822_v2  ;;  %v908_v2 = vunpack.c.l.bf16 %v2296_v24 }
 0x5bb   :  { %v818_v13 = vpop.f32.mrf.mxu1 }
 0x5bc   :  { %v824_v14 = vadd.f32 %v818_v13, %v774_v11  ;;  %v1681_v46 = vmul.f32 -1.442695, %v823_v62  ;;  %v909_v62 = vunpack.c.h.bf16 %v2296_v24 }
 0x5be   :  { %1872 = vtanh.f32 %v824_v14 }
 0x5bf   :  { %1874 = vpow2.f32 %v1679_v26  ;;  %v911_v26 = vunpack.c.h.bf16 %v2306_v37 }
 0x5c0   :  { %1876 = vpow2.f32 %v1681_v46 }
 0x5c7   :  { %v1871_v27 = vpop.eup %1870 }
 0x5c8   :  { %855 = vrot.lane.b32.xlu0 %v1871_v27, %s2091_s7 }
 0x5cb   :  { %v1873_v16 = vpop.eup %1872 }
 0x5cc   :  { %857 = vrot.lane.b32.xlu1 %v1873_v16, %s2091_s7  ;;  %v1875_v18 = vpop.eup %1874 }
 0x5cd   :  { %v837_v21 = vadd.f32 1.0, %v1875_v18  ;;  %v1877_v22 = vpop.eup %1876 }
 0x5ce   :  { %v839_v23 = vadd.f32 1.0, %v1877_v22 }
 0x5cf   :  { %1878 = vrcp.f32 %v837_v21 }
 0x5d0   :  { %1880 = vrcp.f32 %v839_v23 }
 0x5dc   :  { %v1879_v55 = vpop.eup %1878 }
 0x5dd   :  { %v1881_v34 = vpop.eup %1880  ;;  %v851_v30 = vmul.f32 %v1879_v55, %v2417_v31  ;;  %v1682_v31 = vmul.f32 -1.442695, %v824_v14  ;;  %v910_v14 = vunpack.c.l.bf16 %v2306_v37 }
 0x5de   :  { %v852_v33 = vmul.f32 %v1881_v34, %v2421_v36 }
 0x63a   :  { %v856_v28 = vpop.permute.xlu0 %855 }
 0x63b   :  { %v861_v29 = vmul.f32 %v1879_v55, %v856_v28 }
 0x63d   :  { %865 = vrot.lane.b32.xlu0 %v861_v29, %s2091_s7 }
 0x63e   :  { %v858_v32 = vpop.permute.xlu1 %857 }
 0x63f   :  { %v862_v39 = vmul.f32 %v1881_v34, %v858_v32 }
 0x641   :  { %867 = vrot.lane.b32.xlu1 %v862_v39, %s2091_s7 }
 0x6af   :  { %v866_v42 = vpop.permute.xlu0 %865 }
 0x6b0   :  { %v2453_v17 = vadd.f32 %v866_v42, %v851_v30 }
 0x6b2   :  { %1882 = vtanh.f32 %v2453_v17 }
 0x6b3   :  { %v868_v41 = vpop.permute.xlu1 %867 }
 0x6b4   :  { %v2457_v35 = vadd.f32 %v868_v41, %v852_v33 }
 0x6b6   :  { %1884 = vtanh.f32 %v2457_v35 }
 0x6b7   :  { %1886 = vpow2.f32 %v1680_v48 }
 0x6b8   :  { %1888 = vpow2.f32 %v1682_v31 }
 0x6bf   :  { %v1883_v20 = vpop.eup %1882 }
 0x6c0   :  { %877 = vrot.lane.b32.xlu0 %v1883_v20, %s2091_s7 }
 0x6c3   :  { %v1885_v44 = vpop.eup %1884 }
 0x6c4   :  { %879 = vrot.lane.b32.xlu1 %v1885_v44, %s2091_s7  ;;  %v1887_v49 = vpop.eup %1886 }
 0x6c5   :  { %v838_v51 = vadd.f32 1.0, %v1887_v49  ;;  %v1889_v53 = vpop.eup %1888 }
 0x6c6   :  { %v840_v36 = vadd.f32 1.0, %v1889_v53 }
 0x6c7   :  { %1890 = vrcp.f32 %v838_v51 }
 0x6c8   :  { %1892 = vrcp.f32 %v840_v36 }
 0x6d4   :  { %v1891_v54 = vpop.eup %1890 }
 0x6d5   :  { %v1893_v50 = vpop.eup %1892 }
 0x732   :  { %v878_v58 = vpop.permute.xlu0 %877 }
 0x733   :  { %v883_v19 = vmul.f32 %v1891_v54, %v878_v58 }
 0x735   :  { %v1780_v59 = vpack.c.bf16 %v883_v19, %v883_v19 }
 0x736   :  { %v880_v60 = vpop.permute.xlu1 %879 }
 0x737   :  { %1685 = vst.msk [vmem:[%s2793_s6 + $0x10] sm:$0xf] %vm619_vm5, %v1780_v59  ;;  %v884_v61 = vmul.f32 %v1893_v50, %v880_v60 }
 0x739   :  { %v885_v1 = vpack.c.bf16 %v884_v61, %v883_v19  ;;  %v1781_v56 = vpack.c.bf16 %v884_v61, %v884_v61 }
 0x73b   :  { %1686 = vst.msk [vmem:[%s2793_s6 + $0x14] sm:$0xf] %vm619_vm5, %v1781_v56  ;;  %1687 = vmatmul.mubr.msk.bf16.vlgmr.msra.gmra.mxu1 %vm492_vm1, %v885_v1 }
 0x73c   :  { %1186 = vmatpush1.bf16.msra.mxu1 %v2151_v5  ;;  %1209 = vmatprep.mubr.bf16.mxu1 %v2090_v0 }
 0x73d   :  { %1187 = vmatprep.subr.bf16.mxu1 %v2156_v6 }
 0x740   :  { %1188 = vmatpush1.bf16.msra.mxu1 %v2167_v8 }
 0x741   :  { %1189 = vmatprep.subr.bf16.mxu1 %v2174_v9 }
 0x744   :  { %1190 = vmatpush1.bf16.msra.mxu1 %v2183_v10 }
 0x745   :  { %1191 = vmatprep.subr.bf16.mxu1 %v2192_v12 }
 0x748   :  { %1192 = vmatpush1.bf16.msra.mxu1 %v2207_v15 }
 0x749   :  { %1447 = vmatprep.subr.bf16.mxu1 %v2146_v4 }
 0x7fb   :  { %v949_v3 = vpop.f32.mrf.mxu1 }
 0x7fc   :  { %v958_v7 = vadd.f32 %v949_v3, %v908_v2 }
 0x7fd   :  { %v951_v11 = vpop.f32.mrf.mxu1 }
 0x7fe   :  { %v959_v13 = vadd.f32 %v951_v11, %v909_v62  ;;  %v1688_v22 = vmul.f32 -1.442695, %v958_v7  ;;  %v1039_v7 = vunpack.c.l.bf16 %v2300_v25 }
 0x7ff   :  { %v953_v27 = vpop.f32.mrf.mxu1 }
 0x800   :  { %v960_v16 = vadd.f32 %v953_v27, %v910_v14  ;;  %1894 = vtanh.f32 %v959_v13  ;;  %v1689_v53 = vmul.f32 -1.442695, %v959_v13 }
 0x801   :  { %v955_v46 = vpop.f32.mrf.mxu1 }
 0x802   :  { %v961_v18 = vadd.f32 %v955_v46, %v911_v26  ;;  %v1690_v24 = vmul.f32 -1.442695, %v960_v16 }
 0x804   :  { %1896 = vtanh.f32 %v961_v18 }
 0x805   :  { %1898 = vpow2.f32 %v1688_v22 }
 0x806   :  { %1900 = vpow2.f32 %v1690_v24 }
 0x80d   :  { %v1895_v21 = vpop.eup %1894 }
 0x80e   :  { %992 = vrot.lane.b32.xlu0 %v1895_v21, %s2091_s7 }
 0x811   :  { %v1897_v4 = vpop.eup %1896 }
 0x812   :  { %994 = vrot.lane.b32.xlu1 %v1897_v4, %s2091_s7  ;;  %v1899_v23 = vpop.eup %1898 }
 0x813   :  { %v974_v55 = vadd.f32 1.0, %v1899_v23  ;;  %v1901_v28 = vpop.eup %1900 }
 0x814   :  { %v976_v29 = vadd.f32 1.0, %v1901_v28 }
 0x815   :  { %1902 = vrcp.f32 %v974_v55 }
 0x816   :  { %1904 = vrcp.f32 %v976_v29 }
 0x822   :  { %v1903_v37 = vpop.eup %1902 }
 0x823   :  { %v1905_v39 = vpop.eup %1904  ;;  %v988_v33 = vmul.f32 %v1903_v37, %v2453_v17  ;;  %v1691_v17 = vmul.f32 -1.442695, %v961_v18 }
 0x824   :  { %v989_v44 = vmul.f32 %v1905_v39, %v2457_v35 }
 0x880   :  { %v993_v34 = vpop.permute.xlu0 %992 }
 0x881   :  { %v998_v32 = vmul.f32 %v1903_v37, %v993_v34 }
 0x883   :  { %1002 = vrot.lane.b32.xlu0 %v998_v32, %s2091_s7 }
 0x884   :  { %v995_v30 = vpop.permute.xlu1 %994 }
 0x885   :  { %v999_v42 = vmul.f32 %v1905_v39, %v995_v30 }
 0x887   :  { %1004 = vrot.lane.b32.xlu1 %v999_v42, %s2091_s7 }
 0x8f5   :  { %v1003_v41 = vpop.permute.xlu0 %1002 }
 0x8f6   :  { %v2489_v20 = vadd.f32 %v1003_v41, %v988_v33 }
 0x8f8   :  { %1906 = vtanh.f32 %v2489_v20 }
 0x8f9   :  { %v1005_v48 = vpop.permute.xlu1 %1004 }
 0x8fa   :  { %v2493_v31 = vadd.f32 %v1005_v48, %v989_v44 }
 0x8fc   :  { %1908 = vtanh.f32 %v2493_v31 }
 0x8fd   :  { %1910 = vpow2.f32 %v1689_v53 }
 0x8fe   :  { %1912 = vpow2.f32 %v1691_v17 }
 0x905   :  { %v1907_v49 = vpop.eup %1906 }
 0x906   :  { %1014 = vrot.lane.b32.xlu0 %v1907_v49, %s2091_s7 }
 0x909   :  { %v1909_v51 = vpop.eup %1908 }
 0x90a   :  { %1016 = vrot.lane.b32.xlu1 %v1909_v51, %s2091_s7  ;;  %v1911_v36 = vpop.eup %1910 }
 0x90b   :  { %v975_v54 = vadd.f32 1.0, %v1911_v36  ;;  %v1913_v58 = vpop.eup %1912 }
 0x90c   :  { %v977_v35 = vadd.f32 1.0, %v1913_v58 }
 0x90d   :  { %1914 = vrcp.f32 %v975_v54 }
 0x90e   :  { %1916 = vrcp.f32 %v977_v35 }
 0x91a   :  { %v1915_v19 = vpop.eup %1914 }
 0x91b   :  { %v1917_v61 = vpop.eup %1916 }
 0x978   :  { %v1015_v59 = vpop.permute.xlu0 %1014 }
 0x979   :  { %v1020_v50 = vmul.f32 %v1915_v19, %v1015_v59 }
 0x97b   :  { %v1782_v60 = vpack.c.bf16 %v1020_v50, %v1020_v50 }
 0x97c   :  { %v1017_v1 = vpop.permute.xlu1 %1016 }
 0x97d   :  { %1694 = vst.msk [vmem:[%s2793_s6 + $0x18] sm:$0xf] %vm619_vm5, %v1782_v60  ;;  %v1021_v56 = vmul.f32 %v1917_v61, %v1017_v1  ;;  %v2014_v60 = vld [vmem:[%s2789_s2 + $0x30] ss:$8 sps:$4 sm:$0xff]  }
 0x97f   :  { %v1022_v2 = vpack.c.bf16 %v1021_v56, %v1020_v50  ;;  %v1783_v3 = vpack.c.bf16 %v1021_v56, %v1021_v56 }
 0x981   :  { %1695 = vst.msk [vmem:[%s2793_s6 + $0x1c] sm:$0xf] %vm619_vm5, %v1783_v3  ;;  %1696 = vmatmul.mubr.msk.bf16.vlgmr.msra.gmra.mxu0 %vm492_vm1, %v1022_v2  ;;  %v2017_v3 = vld [vmem:[%s2789_s2 + $0x14] ss:$8 sps:$4 sm:$0xff]  }
 0x982   :  { %1317 = vmatpush1.bf16.msra.mxu0 %v2151_v5  ;;  %1340 = vmatprep.mubr.bf16.mxu0 %v2090_v0  ;;  %v1040_v5 = vunpack.c.h.bf16 %v2300_v25 }
 0x983   :  { %1318 = vmatprep.subr.bf16.mxu0 %v2156_v6  ;;  %v1041_v6 = vunpack.c.l.bf16 %v2310_v38 }
 0x984   :  { %v1752_v61 = vld [vmem:[%s2793_s6 + $0x18] sm:$0xf] }
 0x986   :  { %1319 = vmatpush1.bf16.msra.mxu0 %v2167_v8 }
 0x987   :  { %1320 = vmatprep.subr.bf16.mxu0 %v2174_v9  ;;  %v1042_v9 = vunpack.c.h.bf16 %v2310_v38 }
 0x98a   :  { %1321 = vmatpush1.bf16.msra.mxu0 %v2183_v10 }
 0x98b   :  { %1322 = vmatprep.subr.bf16.mxu0 %v2192_v12 }
 0x98e   :  { %1323 = vmatpush1.bf16.msra.mxu0 %v2207_v15 }
 0xa41   :  { %v1080_v62 = vpop.f32.mrf.mxu0 }
 0xa42   :  { %v1089_v11 = vadd.f32 %v1080_v62, %v1039_v7  ;;  %v1753_v7 = vld [vmem:[%s2793_s6 + $0x1c] sm:$0xf] }
 0xa43   :  { %v1082_v13 = vpop.f32.mrf.mxu0 }
 0xa44   :  { %v1090_v14 = vadd.f32 %v1082_v13, %v1040_v5  ;;  %v1697_v26 = vmul.f32 -1.442695, %v1089_v11  ;;  %v2018_v13 = vld [vmem:[%s2789_s2 + $0x10] ss:$8 sps:$4 sm:$0xff]  }
 0xa45   :  { %v1084_v27 = vpop.f32.mrf.mxu0 }
 0xa46   :  { %v1091_v8 = vadd.f32 %v1084_v27, %v1041_v6  ;;  %1918 = vtanh.f32 %v1090_v14  ;;  %v1698_v41 = vmul.f32 -1.442695, %v1090_v14  ;;  %v2019_v14 = vld [vmem:[%s2789_s2 + $0x4] ss:$8 sps:$4 sm:$0xff]   ;;  %v2020_v6 = vld [vmem:[%s2789_s2] ss:$8 sps:$4 sm:$0xff]   ;;  %v1170_v27 = vunpack.c.l.bf16 %v2320_v47 }
 0xa47   :  { %v1086_v10 = vpop.f32.mrf.mxu0 }
 0xa48   :  { %v1092_v16 = vadd.f32 %v1086_v10, %v1042_v9  ;;  %v1699_v25 = vmul.f32 -1.442695, %v1091_v8  ;;  %v1171_v10 = vunpack.c.h.bf16 %v2320_v47 }
 0xa4a   :  { %1920 = vtanh.f32 %v1092_v16 }
 0xa4b   :  { %1922 = vpow2.f32 %v1697_v26 }
 0xa4c   :  { %1924 = vpow2.f32 %v1699_v25 }
 0xa53   :  { %v1919_v12 = vpop.eup %1918 }
 0xa54   :  { %1123 = vrot.lane.b32.xlu0 %v1919_v12, %s2091_s7 }
 0xa57   :  { %v1921_v15 = vpop.eup %1920 }
 0xa58   :  { %1125 = vrot.lane.b32.xlu1 %v1921_v15, %s2091_s7  ;;  %v1923_v46 = vpop.eup %1922  ;;  %v1172_v15 = vunpack.c.l.bf16 %v2330_v57 }
 0xa59   :  { %v1105_v18 = vadd.f32 1.0, %v1923_v46  ;;  %v1925_v21 = vpop.eup %1924  ;;  %v1173_v46 = vunpack.c.h.bf16 %v2330_v57 }
 0xa5a   :  { %v1107_v4 = vadd.f32 1.0, %v1925_v21 }
 0xa5b   :  { %1926 = vrcp.f32 %v1105_v18 }
 0xa5c   :  { %1928 = vrcp.f32 %v1107_v4 }
 0xa68   :  { %v1927_v38 = vpop.eup %1926 }
 0xa69   :  { %v1929_v23 = vpop.eup %1928  ;;  %v1119_v29 = vmul.f32 %v1927_v38, %v2489_v20  ;;  %v1700_v20 = vmul.f32 -1.442695, %v1092_v16 }
 0xa6a   :  { %v1120_v32 = vmul.f32 %v1929_v23, %v2493_v31 }
 0xac6   :  { %v1124_v22 = vpop.permute.xlu0 %1123 }
 0xac7   :  { %v1129_v24 = vmul.f32 %v1927_v38, %v1124_v22 }
 0xac9   :  { %1133 = vrot.lane.b32.xlu0 %v1129_v24, %s2091_s7 }
 0xaca   :  { %v1126_v55 = vpop.permute.xlu1 %1125 }
 0xacb   :  { %v1130_v28 = vmul.f32 %v1929_v23, %v1126_v55 }
 0xacd   :  { %1135 = vrot.lane.b32.xlu1 %v1130_v28, %s2091_s7 }
 0xb3b   :  { %v1134_v37 = vpop.permute.xlu0 %1133 }
 0xb3c   :  { %v2524_v34 = vadd.f32 %v1134_v37, %v1119_v29 }
 0xb3e   :  { %1930 = vtanh.f32 %v2524_v34 }
 0xb3f   :  { %v1136_v39 = vpop.permute.xlu1 %1135 }
 0xb40   :  { %v2528_v30 = vadd.f32 %v1136_v39, %v1120_v32 }
 0xb42   :  { %1932 = vtanh.f32 %v2528_v30 }
 0xb43   :  { %1934 = vpow2.f32 %v1698_v41 }
 0xb44   :  { %1936 = vpow2.f32 %v1700_v20 }
 0xb4b   :  { %v1931_v42 = vpop.eup %1930 }
 0xb4c   :  { %1145 = vrot.lane.b32.xlu0 %v1931_v42, %s2091_s7 }
 0xb4f   :  { %v1933_v33 = vpop.eup %1932 }
 0xb50   :  { %1147 = vrot.lane.b32.xlu1 %v1933_v33, %s2091_s7  ;;  %v1935_v44 = vpop.eup %1934 }
 0xb51   :  { %v1106_v48 = vadd.f32 1.0, %v1935_v44  ;;  %v1937_v49 = vpop.eup %1936 }
 0xb52   :  { %v1108_v31 = vadd.f32 1.0, %v1937_v49 }
 0xb53   :  { %1938 = vrcp.f32 %v1106_v48 }
 0xb54   :  { %1940 = vrcp.f32 %v1108_v31 }
 0xb60   :  { %v1939_v51 = vpop.eup %1938 }
 0xb61   :  { %v1941_v54 = vpop.eup %1940 }
 0xbbe   :  { %v1146_v53 = vpop.permute.xlu0 %1145 }
 0xbbf   :  { %v1151_v17 = vmul.f32 %v1939_v51, %v1146_v53 }
 0xbc1   :  { %v1784_v36 = vpack.c.bf16 %v1151_v17, %v1151_v17 }
 0xbc2   :  { %v1148_v58 = vpop.permute.xlu1 %1147 }
 0xbc3   :  { %1703 = vst.msk [vmem:[%s2793_s6 + $0x20] sm:$0xf] %vm619_vm5, %v1784_v36  ;;  %v1152_v35 = vmul.f32 %v1941_v54, %v1148_v58 }
 0xbc5   :  { %v1153_v19 = vpack.c.bf16 %v1152_v35, %v1151_v17  ;;  %v1785_v59 = vpack.c.bf16 %v1152_v35, %v1152_v35 }
 0xbc7   :  { %1704 = vst.msk [vmem:[%s2793_s6 + $0x24] sm:$0xf] %vm619_vm5, %v1785_v59  ;;  %1705 = vmatmul.mubr.msk.bf16.vlgmr.msra.gmra.mxu1 %vm492_vm1, %v1153_v19 }
 0xbc8   :  { %1448 = vmatpush1.bf16.msra.mxu1 %v2014_v60  ;;  %1471 = vmatprep.mubr.bf16.mxu1 %v2090_v0  ;;  %v2016_v0 = vld [vmem:[%s2789_s2 + $0x20] ss:$8 sps:$4 sm:$0xff]  }
 0xbc9   :  { %1449 = vmatprep.subr.bf16.mxu1 %v2015_v52 }
 0xbca   :  { %v1754_v1 = vld [vmem:[%s2793_s6 + $0x20] sm:$0xf] }
 0xbcb   :  { %v1599_v56 = vsel %vm2543_vm7, %v1752_v61, %v1754_v1  ;;  %v1603_v2 = vsel %vm2543_vm7, %v1754_v1, %v1752_v61 }
 0xbcc   :  { %1756 = vst.msk [vmem:[%s2793_s6 + $0x18] sm:$0xf] %vm619_vm5, %v1599_v56  ;;  %1758 = vst.msk [vmem:[%s2793_s6 + $0x20] sm:$0xf] %vm619_vm5, %v1603_v2  ;;  %1450 = vmatpush1.bf16.msra.mxu1 %v2016_v0  ;;  %v1744_v2 = vld [vmem:[%s2793_s6 + $0x10] sm:$0xf] }
 0xbcd   :  { %1451 = vmatprep.subr.bf16.mxu1 %v2017_v3 }
 0xbce   :  { %v1755_v62 = vld [vmem:[%s2793_s6 + $0x24] sm:$0xf] }
 0xbcf   :  { %v1600_v11 = vsel %vm2543_vm7, %v1753_v7, %v1755_v62  ;;  %v1604_v5 = vsel %vm2543_vm7, %v1755_v62, %v1753_v7  ;;  %v1745_v62 = vld [vmem:[%s2793_s6 + $0x14] sm:$0xf] }
 0xbd0   :  { %1757 = vst.msk [vmem:[%s2793_s6 + $0x1c] sm:$0xf] %vm619_vm5, %v1600_v11  ;;  %1759 = vst.msk [vmem:[%s2793_s6 + $0x24] sm:$0xf] %vm619_vm5, %v1604_v5  ;;  %1452 = vmatpush1.bf16.msra.mxu1 %v2018_v13 }
 0xbd1   :  { %1453 = vmatprep.subr.bf16.mxu1 %v2019_v14  ;;  %v1301_v14 = vunpack.c.l.bf16 %v2342_v63 }
 0xbd4   :  { %1454 = vmatpush1.bf16.msra.mxu1 %v2020_v6 }
 0xc87   :  { %v1211_v8 = vpop.f32.mrf.mxu1 }
 0xc88   :  { %v1220_v9 = vadd.f32 %v1211_v8, %v1170_v27  ;;  %v1302_v8 = vunpack.c.h.bf16 %v2342_v63 }
 0xc89   :  { %v1213_v16 = vpop.f32.mrf.mxu1 }
 0xc8a   :  { %v1221_v12 = vadd.f32 %v1213_v16, %v1171_v10  ;;  %v1706_v22 = vmul.f32 -1.442695, %v1220_v9  ;;  %v1303_v16 = vunpack.c.l.bf16 %v2358_v40 }
 0xc8b   :  { %v1215_v26 = vpop.f32.mrf.mxu1 }
 0xc8c   :  { %v1222_v25 = vadd.f32 %v1215_v26, %v1172_v15  ;;  %1942 = vtanh.f32 %v1221_v12  ;;  %v1707_v53 = vmul.f32 -1.442695, %v1221_v12  ;;  %v1304_v26 = vunpack.c.h.bf16 %v2358_v40 }
 0xc8d   :  { %v1217_v18 = vpop.f32.mrf.mxu1 }
 0xc8e   :  { %v1223_v21 = vadd.f32 %v1217_v18, %v1173_v46  ;;  %v1708_v47 = vmul.f32 -1.442695, %v1222_v25 }
 0xc90   :  { %1944 = vtanh.f32 %v1223_v21 }
 0xc91   :  { %1946 = vpow2.f32 %v1706_v22 }
 0xc92   :  { %1948 = vpow2.f32 %v1708_v47 }
 0xc99   :  { %v1943_v4 = vpop.eup %1942 }
 0xc9a   :  { %1254 = vrot.lane.b32.xlu0 %v1943_v4, %s2091_s7 }
 0xc9d   :  { %v1945_v38 = vpop.eup %1944 }
 0xc9e   :  { %1256 = vrot.lane.b32.xlu1 %v1945_v38, %s2091_s7  ;;  %v1947_v24 = vpop.eup %1946 }
 0xc9f   :  { %v1236_v23 = vadd.f32 1.0, %v1947_v24  ;;  %v1949_v55 = vpop.eup %1948 }
 0xca0   :  { %v1238_v28 = vadd.f32 1.0, %v1949_v55 }
 0xca1   :  { %1950 = vrcp.f32 %v1236_v23 }
 0xca2   :  { %1952 = vrcp.f32 %v1238_v28 }
 0xcae   :  { %v1951_v57 = vpop.eup %1950 }
 0xcaf   :  { %v1953_v32 = vpop.eup %1952  ;;  %v1250_v33 = vmul.f32 %v1951_v57, %v2524_v34  ;;  %v1709_v34 = vmul.f32 -1.442695, %v1223_v21 }
 0xcb0   :  { %v1251_v44 = vmul.f32 %v1953_v32, %v2528_v30 }
 0xd0c   :  { %v1255_v29 = vpop.permute.xlu0 %1254 }
 0xd0d   :  { %v1260_v37 = vmul.f32 %v1951_v57, %v1255_v29 }
 0xd0f   :  { %1264 = vrot.lane.b32.xlu0 %v1260_v37, %s2091_s7 }
 0xd10   :  { %v1257_v39 = vpop.permute.xlu1 %1256 }
 0xd11   :  { %v1261_v42 = vmul.f32 %v1953_v32, %v1257_v39 }
 0xd13   :  { %1266 = vrot.lane.b32.xlu1 %v1261_v42, %s2091_s7 }
 0xd81   :  { %v1265_v41 = vpop.permute.xlu0 %1264 }
 0xd82   :  { %v2614_v20 = vadd.f32 %v1265_v41, %v1250_v33 }
 0xd84   :  { %1954 = vtanh.f32 %v2614_v20 }
 0xd85   :  { %v1267_v48 = vpop.permute.xlu1 %1266 }
 0xd86   :  { %v2618_v49 = vadd.f32 %v1267_v48, %v1251_v44 }
 0xd88   :  { %1956 = vtanh.f32 %v2618_v49 }
 0xd89   :  { %1958 = vpow2.f32 %v1707_v53 }
 0xd8a   :  { %1960 = vpow2.f32 %v1709_v34 }
 0xd91   :  { %v1955_v31 = vpop.eup %1954 }
 0xd92   :  { %1276 = vrot.lane.b32.xlu0 %v1955_v31, %s2091_s7 }
 0xd95   :  { %v1957_v51 = vpop.eup %1956 }
 0xd96   :  { %1278 = vrot.lane.b32.xlu1 %v1957_v51, %s2091_s7  ;;  %v1959_v17 = vpop.eup %1958 }
 0xd97   :  { %v1237_v36 = vadd.f32 1.0, %v1959_v17  ;;  %v1961_v54 = vpop.eup %1960 }
 0xd98   :  { %v1239_v30 = vadd.f32 1.0, %v1961_v54 }
 0xd99   :  { %1962 = vrcp.f32 %v1237_v36 }
 0xd9a   :  { %1964 = vrcp.f32 %v1239_v30 }
 0xda6   :  { %v1963_v58 = vpop.eup %1962 }
 0xda7   :  { %v1965_v60 = vpop.eup %1964 }
 0xe04   :  { %v1277_v35 = vpop.permute.xlu0 %1276 }
 0xe05   :  { %v1282_v19 = vmul.f32 %v1963_v58, %v1277_v35 }
 0xe07   :  { %v1786_v59 = vpack.c.bf16 %v1282_v19, %v1282_v19 }
 0xe08   :  { %v1279_v52 = vpop.permute.xlu1 %1278 }
 0xe09   :  { %1712 = vst.msk [vmem:[%s2793_s6 + $0x28] sm:$0xf] %vm619_vm5, %v1786_v59  ;;  %v1283_v61 = vmul.f32 %v1965_v60, %v1279_v52  ;;  %v1736_v52 = vld [vmem:[%s2793_s6 + $0x8] sm:$0xf] }
 0xe0b   :  { %v1284_v1 = vpack.c.bf16 %v1283_v61, %v1282_v19  ;;  %v1787_v56 = vpack.c.bf16 %v1283_v61, %v1283_v61 }
 0xe0d   :  { %1713 = vst.msk [vmem:[%s2793_s6 + $0x2c] sm:$0xf] %vm619_vm5, %v1787_v56  ;;  %1714 = vmatmul.mubr.msk.bf16.vlgmr.msra.gmra.mxu0 %vm492_vm1, %v1284_v1 }
 0xe10   :  { %v1746_v0 = vld [vmem:[%s2793_s6 + $0x28] sm:$0xf] }
 0xe11   :  { %v1587_v3 = vsel %vm2543_vm7, %v1744_v2, %v1746_v0  ;;  %v1591_v7 = vsel %vm2543_vm7, %v1746_v0, %v1744_v2  ;;  %v1737_v2 = vld [vmem:[%s2793_s6 + $0xc] sm:$0xf] }
 0xe12   :  { %1748 = vst.msk [vmem:[%s2793_s6 + $0x10] sm:$0xf] %vm619_vm5, %v1587_v3  ;;  %1750 = vst.msk [vmem:[%s2793_s6 + $0x28] sm:$0xf] %vm619_vm5, %v1591_v7 }
 0xe14   :  { %v1747_v11 = vld [vmem:[%s2793_s6 + $0x2c] sm:$0xf] }
 0xe15   :  { %v1588_v5 = vsel %vm2543_vm7, %v1745_v62, %v1747_v11  ;;  %v1592_v13 = vsel %vm2543_vm7, %v1747_v11, %v1745_v62  ;;  %v1432_v62 = vunpack.c.l.bf16 %v2370_v45 }
 0xe16   :  { %1749 = vst.msk [vmem:[%s2793_s6 + $0x14] sm:$0xf] %vm619_vm5, %v1588_v5  ;;  %1751 = vst.msk [vmem:[%s2793_s6 + $0x2c] sm:$0xf] %vm619_vm5, %v1592_v13  ;;  %v1433_v13 = vunpack.c.h.bf16 %v2370_v45 }
 0xecd   :  { %v1342_v6 = vpop.f32.mrf.mxu0 }
 0xece   :  { %v1351_v27 = vadd.f32 %v1342_v6, %v1301_v14 }
 0xecf   :  { %v1344_v9 = vpop.f32.mrf.mxu0 }
 0xed0   :  { %v1352_v10 = vadd.f32 %v1344_v9, %v1302_v8  ;;  %v1715_v4 = vmul.f32 -1.442695, %v1351_v27  ;;  %v1434_v27 = vunpack.c.l.bf16 %v2376_v43 }
 0xed1   :  { %v1346_v12 = vpop.f32.mrf.mxu0 }
 0xed2   :  { %v1353_v15 = vadd.f32 %v1346_v12, %v1303_v16  ;;  %1966 = vtanh.f32 %v1352_v10  ;;  %v1716_v31 = vmul.f32 -1.442695, %v1352_v10  ;;  %v1435_v10 = vunpack.c.h.bf16 %v2376_v43 }
 0xed3   :  { %v1348_v25 = vpop.f32.mrf.mxu0 }
 0xed4   :  { %v1354_v46 = vadd.f32 %v1348_v25, %v1304_v26  ;;  %v1717_v63 = vmul.f32 -1.442695, %v1353_v15 }
 0xed6   :  { %1968 = vtanh.f32 %v1354_v46 }
 0xed7   :  { %1970 = vpow2.f32 %v1715_v4 }
 0xed8   :  { %1972 = vpow2.f32 %v1717_v63 }
 0xedf   :  { %v1967_v18 = vpop.eup %1966 }
 0xee0   :  { %1385 = vrot.lane.b32.xlu0 %v1967_v18, %s2091_s7 }
 0xee3   :  { %v1969_v21 = vpop.eup %1968 }
 0xee4   :  { %1387 = vrot.lane.b32.xlu1 %v1969_v21, %s2091_s7  ;;  %v1971_v38 = vpop.eup %1970 }
 0xee5   :  { %v1367_v22 = vadd.f32 1.0, %v1971_v38  ;;  %v1973_v47 = vpop.eup %1972 }
 0xee6   :  { %v1369_v24 = vadd.f32 1.0, %v1973_v47 }
 0xee7   :  { %1974 = vrcp.f32 %v1367_v22 }
 0xee8   :  { %1976 = vrcp.f32 %v1369_v24 }
 0xef4   :  { %v1975_v40 = vpop.eup %1974 }
 0xef5   :  { %v1977_v28 = vpop.eup %1976  ;;  %v1381_v37 = vmul.f32 %v1975_v40, %v2614_v20  ;;  %v1718_v20 = vmul.f32 -1.442695, %v1354_v46 }
 0xef6   :  { %v1382_v42 = vmul.f32 %v1977_v28, %v2618_v49 }
 0xf52   :  { %v1386_v23 = vpop.permute.xlu0 %1385 }
 0xf53   :  { %v1391_v55 = vmul.f32 %v1975_v40, %v1386_v23 }
 0xf55   :  { %1395 = vrot.lane.b32.xlu0 %v1391_v55, %s2091_s7 }
 0xf56   :  { %v1388_v57 = vpop.permute.xlu1 %1387 }
 0xf57   :  { %v1392_v29 = vmul.f32 %v1977_v28, %v1388_v57 }
 0xf59   :  { %1397 = vrot.lane.b32.xlu1 %v1392_v29, %s2091_s7 }
 0xfc7   :  { %v1396_v32 = vpop.permute.xlu0 %1395 }
 0xfc8   :  { %v2677_v39 = vadd.f32 %v1396_v32, %v1381_v37 }
 0xfca   :  { %1978 = vtanh.f32 %v2677_v39 }
 0xfcb   :  { %v1398_v33 = vpop.permute.xlu1 %1397 }
 0xfcc   :  { %v2681_v41 = vadd.f32 %v1398_v33, %v1382_v42 }
 0xfce   :  { %1980 = vtanh.f32 %v2681_v41 }
 0xfcf   :  { %1982 = vpow2.f32 %v1716_v31 }
 0xfd0   :  { %1984 = vpow2.f32 %v1718_v20 }
 0xfd7   :  { %v1979_v44 = vpop.eup %1978 }
 0xfd8   :  { %1407 = vrot.lane.b32.xlu0 %v1979_v44, %s2091_s7 }
 0xfdb   :  { %v1981_v48 = vpop.eup %1980 }
 0xfdc   :  { %1409 = vrot.lane.b32.xlu1 %v1981_v48, %s2091_s7  ;;  %v1983_v51 = vpop.eup %1982 }
 0xfdd   :  { %v1368_v53 = vadd.f32 1.0, %v1983_v51  ;;  %v1985_v34 = vpop.eup %1984 }
 0xfde   :  { %v1370_v49 = vadd.f32 1.0, %v1985_v34 }
 0xfdf   :  { %1986 = vrcp.f32 %v1368_v53 }
 0xfe0   :  { %1988 = vrcp.f32 %v1370_v49 }
 0xfec   :  { %v1987_v17 = vpop.eup %1986 }
 0xfed   :  { %v1989_v58 = vpop.eup %1988 }
0x104a   :  { %v1408_v36 = vpop.permute.xlu0 %1407 }
0x104b   :  { %v1413_v54 = vmul.f32 %v1987_v17, %v1408_v36 }
0x104d   :  { %v1788_v30 = vpack.c.bf16 %v1413_v54, %v1413_v54 }
0x104e   :  { %v1410_v35 = vpop.permute.xlu1 %1409 }
0x104f   :  { %1721 = vst.msk [vmem:[%s2793_s6 + $0x30] sm:$0xf] %vm619_vm5, %v1788_v30  ;;  %v1414_v19 = vmul.f32 %v1989_v58, %v1410_v35 }
0x1051   :  { %v1415_v59 = vpack.c.bf16 %v1414_v19, %v1413_v54  ;;  %v1789_v60 = vpack.c.bf16 %v1414_v19, %v1414_v19  ;;  %v1558_v54 = vld [vmem:[%s2793_s6] sm:$0xf]  ;;  %v1559_v19 = vld [vmem:[%s2793_s6 + $0x4] sm:$0xf] }
0x1053   :  { %1722 = vst.msk [vmem:[%s2793_s6 + $0x34] sm:$0xf] %vm619_vm5, %v1789_v60  ;;  %1723 = vmatmul.mubr.msk.bf16.vlgmr.msra.gmra.mxu1 %vm492_vm1, %v1415_v59 }
0x1056   :  { %v1738_v61 = vld [vmem:[%s2793_s6 + $0x30] sm:$0xf] }
0x1057   :  { %v1575_v1 = vsel %vm2543_vm7, %v1736_v52, %v1738_v61  ;;  %v1579_v56 = vsel %vm2543_vm7, %v1738_v61, %v1736_v52 }
0x1058   :  { %1740 = vst.msk [vmem:[%s2793_s6 + $0x8] sm:$0xf] %vm619_vm5, %v1575_v1  ;;  %1742 = vst.msk [vmem:[%s2793_s6 + $0x30] sm:$0xf] %vm619_vm5, %v1579_v56 }
0x105a   :  { %v1739_v0 = vld [vmem:[%s2793_s6 + $0x34] sm:$0xf] }
0x105b   :  { %v1576_v3 = vsel %vm2543_vm7, %v1737_v2, %v1739_v0  ;;  %v1580_v7 = vsel %vm2543_vm7, %v1739_v0, %v1737_v2 }
0x105c   :  { %1741 = vst.msk [vmem:[%s2793_s6 + $0xc] sm:$0xf] %vm619_vm5, %v1576_v3  ;;  %1743 = vst.msk [vmem:[%s2793_s6 + $0x34] sm:$0xf] %vm619_vm5, %v1580_v7 }
0x1113   :  { %v1473_v11 = vpop.f32.mrf.mxu1 }
0x1114   :  { %v1482_v5 = vadd.f32 %v1473_v11, %v1432_v62 }
0x1115   :  { %v1475_v14 = vpop.f32.mrf.mxu1 }
0x1116   :  { %v1483_v6 = vadd.f32 %v1475_v14, %v1433_v13  ;;  %v1724_v25 = vmul.f32 -1.442695, %v1482_v5 }
0x1117   :  { %v1477_v8 = vpop.f32.mrf.mxu1 }
0x1118   :  { %v1484_v9 = vadd.f32 %v1477_v8, %v1434_v27  ;;  %1990 = vtanh.f32 %v1483_v6  ;;  %v1725_v42 = vmul.f32 -1.442695, %v1483_v6 }
0x1119   :  { %v1479_v16 = vpop.f32.mrf.mxu1 }
0x111a   :  { %v1485_v12 = vadd.f32 %v1479_v16, %v1435_v10  ;;  %v1726_v45 = vmul.f32 -1.442695, %v1484_v9 }
0x111c   :  { %1992 = vtanh.f32 %v1485_v12  ;;  %v1727_v33 = vmul.f32 -1.442695, %v1485_v12 }
0x111d   :  { %1994 = vpow2.f32 %v1724_v25 }
0x111e   :  { %1996 = vpow2.f32 %v1726_v45 }
0x1125   :  { %v1991_v15 = vpop.eup %1990 }
0x1126   :  { %1516 = vrot.lane.b32.xlu0 %v1991_v15, %s2091_s7 }
0x1129   :  { %v1993_v26 = vpop.eup %1992 }
0x112a   :  { %1518 = vrot.lane.b32.xlu1 %v1993_v26, %s2091_s7  ;;  %v1995_v46 = vpop.eup %1994 }
0x112b   :  { %v1498_v18 = vadd.f32 1.0, %v1995_v46  ;;  %v1997_v21 = vpop.eup %1996 }
0x112c   :  { %v1500_v4 = vadd.f32 1.0, %v1997_v21 }
0x112d   :  { %1998 = vrcp.f32 %v1498_v18 }
0x112e   :  { %2000 = vrcp.f32 %v1500_v4 }
0x113a   :  { %v1999_v43 = vpop.eup %1998 }
0x113b   :  { %v2001_v22 = vpop.eup %2000  ;;  %v1512_v40 = vmul.f32 %v1999_v43, %v2677_v39 }
0x113c   :  { %v1513_v28 = vmul.f32 %v2001_v22, %v2681_v41 }
0x1198   :  { %v1517_v63 = vpop.permute.xlu0 %1516 }
0x1199   :  { %v1522_v38 = vmul.f32 %v1999_v43, %v1517_v63 }
0x119b   :  { %1526 = vrot.lane.b32.xlu0 %v1522_v38, %s2091_s7 }
0x119c   :  { %v1519_v47 = vpop.permute.xlu1 %1518 }
0x119d   :  { %v1523_v24 = vmul.f32 %v2001_v22, %v1519_v47 }
0x119f   :  { %1528 = vrot.lane.b32.xlu1 %v1523_v24, %s2091_s7 }
0x120d   :  { %v1527_v23 = vpop.permute.xlu0 %1526 }
0x120e   :  { %v1532_v55 = vadd.f32 %v1527_v23, %v1512_v40 }
0x1210   :  { %2002 = vtanh.f32 %v1532_v55 }
0x1211   :  { %v1529_v57 = vpop.permute.xlu1 %1528 }
0x1212   :  { %v1533_v29 = vadd.f32 %v1529_v57, %v1513_v28 }
0x1214   :  { %2004 = vtanh.f32 %v1533_v29 }
0x1215   :  { %2006 = vpow2.f32 %v1725_v42 }
0x1216   :  { %2008 = vpow2.f32 %v1727_v33 }
0x121d   :  { %v2003_v37 = vpop.eup %2002 }
0x121e   :  { %1538 = vrot.lane.b32.xlu0 %v2003_v37, %s2091_s7 }
0x1221   :  { %v2005_v32 = vpop.eup %2004 }
0x1222   :  { %1540 = vrot.lane.b32.xlu1 %v2005_v32, %s2091_s7  ;;  %v2007_v44 = vpop.eup %2006 }
0x1223   :  { %v1499_v39 = vadd.f32 1.0, %v2007_v44  ;;  %v2009_v48 = vpop.eup %2008 }
0x1224   :  { %v1501_v31 = vadd.f32 1.0, %v2009_v48 }
0x1225   :  { %2010 = vrcp.f32 %v1499_v39 }
0x1226   :  { %2012 = vrcp.f32 %v1501_v31 }
0x1232   :  { %v2011_v41 = vpop.eup %2010 }
0x1233   :  { %v2013_v34 = vpop.eup %2012 }
0x1290   :  { %v1539_v20 = vpop.permute.xlu0 %1538 }
0x1291   :  { %v1544_v51 = vmul.f32 %v2011_v41, %v1539_v20 }
0x1293   :  { %v1790_v53 = vpack.c.bf16 %v1544_v51, %v1544_v51 }
0x1294   :  { %v1541_v49 = vpop.permute.xlu1 %1540 }
0x1295   :  { %1730 = vst.msk [vmem:[%s2793_s6 + $0x38] sm:$0xf] %vm619_vm5, %v1790_v53  ;;  %v1545_v17 = vmul.f32 %v2013_v34, %v1541_v49 }
0x1297   :  { %v1791_v36 = vpack.c.bf16 %v1545_v17, %v1545_v17 }
0x1299   :  { %1731 = vst.msk [vmem:[%s2793_s6 + $0x3c] sm:$0xf] %vm619_vm5, %v1791_v36 }
0x129c   :  { %v1732_v30 = vld [vmem:[%s2793_s6 + $0x38] sm:$0xf] }
0x129d   :  { %v1563_v58 = vsel %vm2543_vm7, %v1558_v54, %v1732_v30  ;;  %v1567_v35 = vsel %vm2543_vm7, %v1732_v30, %v1558_v54 }
0x129e   :  { %1565 = vst.msk [vmem:[%s2793_s6] sm:$0xf] %vm619_vm5, %v1563_v58  ;;  %1734 = vst.msk [vmem:[%s2793_s6 + $0x38] sm:$0xf] %vm619_vm5, %v1567_v35 }
0x12a0   :  { %v1733_v59 = vld [vmem:[%s2793_s6 + $0x3c] sm:$0xf] }
0x12a1   :  { %v1564_v60 = vsel %vm2543_vm7, %v1559_v19, %v1733_v59  ;;  %v1568_v52 = vsel %vm2543_vm7, %v1733_v59, %v1559_v19 }
0x12a2   :  { %1566 = vst.msk [vmem:[%s2793_s6 + $0x4] sm:$0xf] %vm619_vm5, %v1564_v60  ;;  %1735 = vst.msk [vmem:[%s2793_s6 + $0x3c] sm:$0xf] %vm619_vm5, %v1568_v52 }
0x12a3   :  { %1611 = vsyncpa [#allocation4], 1 }
0x12a4   :  { %1612 = vsyncpa [#allocation6], 1 }

</bundles_post_ra>
